<compile_context>
chip_gen: v7x
topology: tpu7x:2x2x1
jax: 0.10.0
libtpu: 0.0.40
codegen_flags: <defaults>
</compile_context>

<pallas_src>
import jax
import jax.numpy as jnp
from jax.experimental import pallas as pl
from jax.experimental.pallas import tpu as pltpu

IN_DIM = 32 * 32 * 3   # 3072
H_DIM = 50
OUT_DIM = 10


def q4_mlp_kernel(x_ref, w1_ref, b1_ref, w2_ref, b2_ref, w3_ref, b3_ref, o_ref):
    # Memory-bound on the x tile DMA; keep everything in f32 (compute is free).
    x = x_ref[...]                                                       # (TM, 3072)

    # fc1 + sigmoid
    h1 = jnp.dot(x, w1_ref[...], preferred_element_type=jnp.float32) + b1_ref[...]
    h1 = jax.nn.sigmoid(h1)                                              # (TM, 50)

    # fc2 + sigmoid
    h2 = jnp.dot(h1, w2_ref[...], preferred_element_type=jnp.float32) + b2_ref[...]
    h2 = jax.nn.sigmoid(h2)                                              # (TM, 50)

    # fc3 + log_softmax(dim=1)
    logits = jnp.dot(h2, w3_ref[...], preferred_element_type=jnp.float32) + b3_ref[...]
    m = jnp.max(logits, axis=1, keepdims=True)
    shifted = logits - m
    lse = jnp.log(jnp.sum(jnp.exp(shifted), axis=1, keepdims=True))
    o_ref[...] = (shifted - lse).astype(o_ref.dtype)                     # (TM, 10)


def _round_up(v, m):
    return (v + m - 1) // m * m


def _device_config():
    """Per-generation (max_tile_rows, vmem_limit_bytes, min_grid_steps)."""
    try:
        kind = jax.devices()[0].device_kind.lower()
    except Exception:
        kind = ""
    if "v7" in kind:
        # 64 MiB VMEM per TensorCore; modest tiles, >=2 grid steps so the
        # "parallel" batch axis can shard across both TensorCores.
        return 512, None, 2
    if "v6" in kind:
        # 128 MiB physical VMEM / ~1.4 TB/s HBM: big tiles amortize the
        # ~0.35 us per-grid-step overhead.
        return 1024, 64 << 20, 1
    if "v5" in kind:
        # Raise the 16 MiB scoped-VMEM default so a 512-row tile fits.
        return 512, 32 << 20, 1
    return 256, None, 1


def _choose_tm(b8, max_tm, min_steps):
    """Largest tile <= max_tm keeping padding waste <~10%; honor min grid steps."""
    cap = max_tm
    if min_steps > 1 and b8 >= min_steps * 8:
        cap = min(cap, _round_up(pl.cdiv(b8, min_steps), 8))
    if b8 <= cap:
        return b8                       # single tile covering the whole batch
    for cand in (1024, 512, 256, 128, 64, 32, 16, 8):
        if cand > cap:
            continue
        if _round_up(b8, cand) - b8 <= max(b8 // 10, 0):
            return cand
    return 8


def q4_forward(x_nchw, params):
    w1, b1, w2, b2, w3, b3 = params
    B = x_nchw.shape[0]

    # torch's x.view(-1, 3072) on a contiguous NCHW tensor == reshape(B, 3072).
    # Keep the caller's dtype (feed bf16 upstream to halve the dominant DMA).
    x_flat = x_nchw.reshape(B, IN_DIM)

    max_tm, vmem_limit, min_steps = _device_config()
    b8 = _round_up(B, 8)                # sublane alignment
    TM = _choose_tm(b8, max_tm, min_steps)
    Bp = _round_up(b8, TM)
    if Bp != B:
        x_flat = jnp.pad(x_flat, ((0, Bp - B), (0, 0)))

    grid = (Bp // TM,)

    flops = 2 * Bp * (IN_DIM * H_DIM + H_DIM * H_DIM + H_DIM * OUT_DIM)
    weight_bytes = 4 * (IN_DIM * H_DIM + H_DIM * H_DIM + H_DIM * OUT_DIM
                        + 2 * H_DIM + OUT_DIM)
    bytes_accessed = (Bp * IN_DIM * x_flat.dtype.itemsize
                      + weight_bytes + Bp * OUT_DIM * 4)

    out = pl.pallas_call(
        q4_mlp_kernel,
        out_shape=jax.ShapeDtypeStruct((Bp, OUT_DIM), jnp.float32),
        grid=grid,
        in_specs=[
            # x: batch-tiled -> double-buffered across grid steps
            pl.BlockSpec((TM, IN_DIM), lambda i: (i, 0)),
            # weights / biases: constant index_map -> fetched once, stay resident
            pl.BlockSpec((IN_DIM, H_DIM), lambda i: (0, 0)),
            pl.BlockSpec((1, H_DIM), lambda i: (0, 0)),
            pl.BlockSpec((H_DIM, H_DIM), lambda i: (0, 0)),
            pl.BlockSpec((1, H_DIM), lambda i: (0, 0)),
            pl.BlockSpec((H_DIM, OUT_DIM), lambda i: (0, 0)),
            pl.BlockSpec((1, OUT_DIM), lambda i: (0, 0)),
        ],
        out_specs=pl.BlockSpec((TM, OUT_DIM), lambda i: (i, 0)),
        compiler_params=pltpu.CompilerParams(
            dimension_semantics=("parallel",),   # lets v7x shard tiles across 2 TCs
            vmem_limit_bytes=vmem_limit,
        ),
        cost_estimate=pl.CostEstimate(
            flops=flops,
            transcendentals=Bp * (2 * H_DIM + OUT_DIM),
            bytes_accessed=bytes_accessed,
        ),
    )(x_flat, w1, b1, w2, b2, w3, b3)

    return out[:B]


def init_params(key):
    # Deterministic init mimicking nn.Linear's uniform(-1/sqrt(fan_in), 1/sqrt(fan_in)).
    # Weights stored transposed (in_dim, out_dim) so the kernel does x @ W.
    k1, k2, k3, k4, k5, k6 = jax.random.split(key, 6)

    def lin(kw, kb, fan_in, fan_out):
        bound = 1.0 / jnp.sqrt(jnp.float32(fan_in))
        w = jax.random.uniform(kw, (fan_in, fan_out), jnp.float32, -bound, bound)
        b = jax.random.uniform(kb, (1, fan_out), jnp.float32, -bound, bound)
        return w, b

    w1, b1 = lin(k1, k2, IN_DIM, H_DIM)
    w2, b2 = lin(k3, k4, H_DIM, H_DIM)
    w3, b3 = lin(k5, k6, H_DIM, OUT_DIM)
    return (w1, b1, w2, b2, w3, b3)


def q4_reference(x_nchw, params):
    # Pure-JAX reference mirroring the PyTorch forward (all f32).
    w1, b1, w2, b2, w3, b3 = params
    x = x_nchw.reshape(x_nchw.shape[0], IN_DIM).astype(jnp.float32)
    h1 = jax.nn.sigmoid(x @ w1 + b1)
    h2 = jax.nn.sigmoid(h1 @ w2 + b2)
    logits = h2 @ w3 + b3
    return jax.nn.log_softmax(logits, axis=1)


if __name__ == "__main__":
    key = jax.random.PRNGKey(0)
    kx, kp = jax.random.split(key)
    # Small batch, CIFAR-like NCHW input implied by the 32*32*3 flatten.
    x = jax.random.normal(kx, (4, 3, 32, 32), dtype=jnp.float32)
    params = init_params(kp)

    out = q4_forward(x, params)
    out = jax.block_until_ready(out)

    # Sanity: shape, finiteness, log_softmax rows logsumexp to ~0, and parity
    # with the pure-JAX (f32) reference of the torch forward.
    ref = q4_reference(x, params)
    row_lse = jax.nn.logsumexp(out, axis=1)
    assert out.shape == (4, 10)
    assert bool(jnp.all(jnp.isfinite(out)))
    assert bool(jnp.all(jnp.abs(row_lse) < 1e-3))
    assert bool(jnp.allclose(out, ref, atol=1e-4, rtol=1e-4))

    print("KERNEL_OK")
</pallas_src>

<mosaic_0001>
module attributes {stable_mosaic.version = 11 : i64} {
  func.func @q4_mlp_kernel(%arg0: i32, %arg1: memref<8x3072xf32, #tpu.memory_space<vmem>>, %arg2: memref<3072x50xf32, #tpu.memory_space<vmem>>, %arg3: memref<1x50xf32, #tpu.memory_space<vmem>>, %arg4: memref<50x50xf32, #tpu.memory_space<vmem>>, %arg5: memref<1x50xf32, #tpu.memory_space<vmem>>, %arg6: memref<50x10xf32, #tpu.memory_space<vmem>>, %arg7: memref<1x10xf32, #tpu.memory_space<vmem>>, %arg8: memref<8x10xf32, #tpu.memory_space<vmem>>) attributes {dimension_semantics = [#tpu.dimension_semantics<parallel>], iteration_bounds = array<i64: 1>, scalar_prefetch = 0 : i64, scratch_operands = 0 : i64, tpu.core_type = #tpu.core_type<tc>, window_params = [{transform_indices = @transform_0, window_bounds = array<i64: 8, 3072>}, {pipeline_mode = #tpu.pipeline_mode<synchronous>, transform_indices = @transform_1, window_bounds = array<i64: 3072, 50>}, {pipeline_mode = #tpu.pipeline_mode<synchronous>, transform_indices = @transform_2, window_bounds = array<i64: 1, 50>}, {pipeline_mode = #tpu.pipeline_mode<synchronous>, transform_indices = @transform_3, window_bounds = array<i64: 50, 50>}, {pipeline_mode = #tpu.pipeline_mode<synchronous>, transform_indices = @transform_4, window_bounds = array<i64: 1, 50>}, {pipeline_mode = #tpu.pipeline_mode<synchronous>, transform_indices = @transform_5, window_bounds = array<i64: 50, 10>}, {pipeline_mode = #tpu.pipeline_mode<synchronous>, transform_indices = @transform_6, window_bounds = array<i64: 1, 10>}, {transform_indices = @transform_7, window_bounds = array<i64: 8, 10>}]} {
    %c0 = arith.constant 0 : index
    %c0_0 = arith.constant 0 : index
    %0 = vector.load %arg1[%c0, %c0_0] : memref<8x3072xf32, #tpu.memory_space<vmem>>, vector<8x3072xf32>
    %c0_1 = arith.constant 0 : index
    %c0_2 = arith.constant 0 : index
    %1 = vector.load %arg2[%c0_1, %c0_2] : memref<3072x50xf32, #tpu.memory_space<vmem>>, vector<3072x50xf32>
    %cst = arith.constant dense<0.000000e+00> : vector<8x50xf32>
    %2 = tpu.matmul %0, %1, %cst {dimension_numbers = #tpu.dot_dimension_numbers<[1], [0], [0], [1], [0, 0, 1, 1], [], []>} : vector<8x3072xf32>, vector<3072x50xf32>, vector<8x50xf32> -> vector<8x50xf32>
    %c0_3 = arith.constant 0 : index
    %c0_4 = arith.constant 0 : index
    %3 = vector.load %arg3[%c0_3, %c0_4] : memref<1x50xf32, #tpu.memory_space<vmem>>, vector<1x50xf32>
    %4 = vector.broadcast %3 : vector<1x50xf32> to vector<8x50xf32>
    %5 = arith.addf %2, %4 : vector<8x50xf32>
    %6 = arith.negf %5 : vector<8x50xf32>
    %7 = math.exp %6 : vector<8x50xf32>
    %cst_5 = arith.constant 1.000000e+00 : f32
    %8 = vector.broadcast %cst_5 : f32 to vector<8x50xf32>
    %9 = arith.addf %8, %7 : vector<8x50xf32>
    %10 = arith.divf %8, %9 : vector<8x50xf32>
    %c0_6 = arith.constant 0 : index
    %c0_7 = arith.constant 0 : index
    %11 = vector.load %arg4[%c0_6, %c0_7] : memref<50x50xf32, #tpu.memory_space<vmem>>, vector<50x50xf32>
    %cst_8 = arith.constant dense<0.000000e+00> : vector<8x50xf32>
    %12 = tpu.matmul %10, %11, %cst_8 {dimension_numbers = #tpu.dot_dimension_numbers<[1], [0], [0], [1], [0, 0, 1, 1], [], []>} : vector<8x50xf32>, vector<50x50xf32>, vector<8x50xf32> -> vector<8x50xf32>
    %c0_9 = arith.constant 0 : index
    %c0_10 = arith.constant 0 : index
    %13 = vector.load %arg5[%c0_9, %c0_10] : memref<1x50xf32, #tpu.memory_space<vmem>>, vector<1x50xf32>
    %14 = vector.broadcast %13 : vector<1x50xf32> to vector<8x50xf32>
    %15 = arith.addf %12, %14 : vector<8x50xf32>
    %16 = arith.negf %15 : vector<8x50xf32>
    %17 = math.exp %16 : vector<8x50xf32>
    %cst_11 = arith.constant 1.000000e+00 : f32
    %18 = vector.broadcast %cst_11 : f32 to vector<8x50xf32>
    %19 = arith.addf %18, %17 : vector<8x50xf32>
    %20 = arith.divf %18, %19 : vector<8x50xf32>
    %c0_12 = arith.constant 0 : index
    %c0_13 = arith.constant 0 : index
    %21 = vector.load %arg6[%c0_12, %c0_13] : memref<50x10xf32, #tpu.memory_space<vmem>>, vector<50x10xf32>
    %cst_14 = arith.constant dense<0.000000e+00> : vector<8x10xf32>
    %22 = tpu.matmul %20, %21, %cst_14 {dimension_numbers = #tpu.dot_dimension_numbers<[1], [0], [0], [1], [0, 0, 1, 1], [], []>} : vector<8x50xf32>, vector<50x10xf32>, vector<8x10xf32> -> vector<8x10xf32>
    %c0_15 = arith.constant 0 : index
    %c0_16 = arith.constant 0 : index
    %23 = vector.load %arg7[%c0_15, %c0_16] : memref<1x10xf32, #tpu.memory_space<vmem>>, vector<1x10xf32>
    %24 = vector.broadcast %23 : vector<1x10xf32> to vector<8x10xf32>
    %25 = arith.addf %22, %24 : vector<8x10xf32>
    %cst_17 = arith.constant dense<0xFF800000> : vector<8xf32>
    %26 = vector.multi_reduction <maximumf>, %25, %cst_17 [1] : vector<8x10xf32> to vector<8xf32>
    %27 = vector.shape_cast %26 : vector<8xf32> to vector<8x1xf32>
    %28 = vector.broadcast %27 : vector<8x1xf32> to vector<8x10xf32>
    %29 = arith.subf %25, %28 : vector<8x10xf32>
    %30 = math.exp %29 : vector<8x10xf32>
    %cst_18 = arith.constant dense<0.000000e+00> : vector<8xf32>
    %31 = vector.multi_reduction <add>, %30, %cst_18 [1] : vector<8x10xf32> to vector<8xf32>
    %32 = vector.shape_cast %31 : vector<8xf32> to vector<8x1xf32>
    %33 = math.log %32 : vector<8x1xf32>
    %34 = vector.broadcast %33 : vector<8x1xf32> to vector<8x10xf32>
    %35 = arith.subf %29, %34 : vector<8x10xf32>
    %c0_19 = arith.constant 0 : index
    %c0_20 = arith.constant 0 : index
    %36 = vector.load %arg8[%c0_19, %c0_20] : memref<8x10xf32, #tpu.memory_space<vmem>>, vector<8x10xf32>
    tpu.vector_store %arg8[%c0_19, %c0_20], %35 {strides = array<i32>} : memref<8x10xf32, #tpu.memory_space<vmem>>, vector<8x10xf32>,
    return
  }
  func.func @transform_0(%arg0: i32) -> (i32, i32) {
    %c0_i32 = arith.constant 0 : i32
    %c0_i32_0 = arith.constant 0 : i32
    return %arg0, %c0_i32 : i32, i32
  }
  func.func @transform_1(%arg0: i32) -> (i32, i32) {
    %c0_i32 = arith.constant 0 : i32
    %c0_i32_0 = arith.constant 0 : i32
    %c0_i32_1 = arith.constant 0 : i32
    return %c0_i32, %c0_i32_0 : i32, i32
  }
  func.func @transform_2(%arg0: i32) -> (i32, i32) {
    %c0_i32 = arith.constant 0 : i32
    %c0_i32_0 = arith.constant 0 : i32
    %c0_i32_1 = arith.constant 0 : i32
    return %c0_i32, %c0_i32_0 : i32, i32
  }
  func.func @transform_3(%arg0: i32) -> (i32, i32) {
    %c0_i32 = arith.constant 0 : i32
    %c0_i32_0 = arith.constant 0 : i32
    %c0_i32_1 = arith.constant 0 : i32
    return %c0_i32, %c0_i32_0 : i32, i32
  }
  func.func @transform_4(%arg0: i32) -> (i32, i32) {
    %c0_i32 = arith.constant 0 : i32
    %c0_i32_0 = arith.constant 0 : i32
    %c0_i32_1 = arith.constant 0 : i32
    return %c0_i32, %c0_i32_0 : i32, i32
  }
  func.func @transform_5(%arg0: i32) -> (i32, i32) {
    %c0_i32 = arith.constant 0 : i32
    %c0_i32_0 = arith.constant 0 : i32
    %c0_i32_1 = arith.constant 0 : i32
    return %c0_i32, %c0_i32_0 : i32, i32
  }
  func.func @transform_6(%arg0: i32) -> (i32, i32) {
    %c0_i32 = arith.constant 0 : i32
    %c0_i32_0 = arith.constant 0 : i32
    %c0_i32_1 = arith.constant 0 : i32
    return %c0_i32, %c0_i32_0 : i32, i32
  }
  func.func @transform_7(%arg0: i32) -> (i32, i32) {
    %c0_i32 = arith.constant 0 : i32
    %c0_i32_0 = arith.constant 0 : i32
    return %arg0, %c0_i32 : i32, i32
  }
}

</mosaic_0001>

<bundles_post_ra>
// kernel: tpu_custom_call.1
= control target key start
LH: loop header
LB: loop body
LE: loop exit
PB: predicated region body
PF: predicated region fallthrough
CT: control target
= control target key end

     0   :  { %s3769_s0 = inlined_call_operand.vmem [shape: f32[8,3072], index: 0, kind: input, shape index: {}]   ;;  %s3770_s1 = inlined_call_operand.vmem [shape: f32[3072,50], index: 1, kind: input, shape index: {}]   ;;  %s3771_s2 = inlined_call_operand.vmem [shape: f32[1,50], index: 2, kind: input, shape index: {}]   ;;  %s3772_s3 = inlined_call_operand.vmem [shape: f32[50,50], index: 3, kind: input, shape index: {}]   ;;  %s3773_s4 = inlined_call_operand.vmem [shape: f32[1,50], index: 4, kind: input, shape index: {}]   ;;  %s3774_s5 = inlined_call_operand.vmem [shape: f32[50,10], index: 5, kind: input, shape index: {}]   ;;  %s3775_s6 = inlined_call_operand.vmem [shape: f32[1,10], index: 6, kind: input, shape index: {}]   ;;  %s3776_s7 = inlined_call_operand.hbm [shape: f32[8,10], index: 7, kind: output, shape index: {}]  }
   0x1   :  { %v67_v0 = vld [vmem:[%s3770_s1 + $0x80] sm:$0xff]  ;;  %v68_v1 = vld [vmem:[%s3770_s1 + $0x88] sm:$0xff]  ;;  %v69_v11 = vld [vmem:[%s3770_s1 + $0x90] sm:$0xff] }
   0x2   :  { %v51_v2 = vld [vmem:[%s3770_s1] sm:$0xff]  ;;  %v1983_v3 = vpack.c.bf16 %v68_v1, %v67_v0  ;;  %v52_v4 = vld [vmem:[%s3770_s1 + $0x8] sm:$0xff]  ;;  %v70_v13 = vld [vmem:[%s3770_s1 + $0x98] sm:$0xff] }
   0x3   :  { %v99_v5 = vld [vmem:[%s3770_s1 + $0x180] sm:$0xff]  ;;  %v100_v6 = vld [vmem:[%s3770_s1 + $0x188] sm:$0xff]  ;;  %v1985_v7 = vpack.c.bf16 %v52_v4, %v51_v2  ;;  %v53_v14 = vld [vmem:[%s3770_s1 + $0x10] sm:$0xff]  ;;  %v1987_v16 = vpack.c.bf16 %v70_v13, %v69_v11 }
   0x4   :  { %v2015_v8 = vpack.c.bf16 %v100_v6, %v99_v5  ;;  %v83_v9 = vld [vmem:[%s3770_s1 + $0x100] sm:$0xff]  ;;  %v84_v10 = vld [vmem:[%s3770_s1 + $0x108] sm:$0xff]  ;;  %1984 = vmatprep.subr.bf16.mxu0 %v1983_v3  ;;  %v54_v15 = vld [vmem:[%s3770_s1 + $0x18] sm:$0xff] }
   0x5   :  { %v2017_v12 = vpack.c.bf16 %v84_v10, %v83_v9  ;;  %1986 = vmatpush3.bf16.msra.mxu0 %v1985_v7  ;;  %v1989_v17 = vpack.c.bf16 %v54_v15, %v53_v14  ;;  %v101_v18 = vld [vmem:[%s3770_s1 + $0x190] sm:$0xff]  ;;  %v102_v19 = vld [vmem:[%s3770_s1 + $0x198] sm:$0xff]  ;;  %v71_v23 = vld [vmem:[%s3770_s1 + $0xa0] sm:$0xff] }
   0x6   :  { %2016 = vmatprep.subr.bf16.mxu1 %v2015_v8  ;;  %v85_v20 = vld [vmem:[%s3770_s1 + $0x110] sm:$0xff]  ;;  %v2019_v21 = vpack.c.bf16 %v102_v19, %v101_v18  ;;  %v86_v22 = vld [vmem:[%s3770_s1 + $0x118] sm:$0xff]  ;;  %v72_v24 = vld [vmem:[%s3770_s1 + $0xa8] sm:$0xff]  ;;  %1988 = vmatprep.subr.bf16.mxu0 %v1987_v16 }
   0x7   :  { %2018 = vmatpush3.bf16.msra.mxu1 %v2017_v12  ;;  %v2021_v25 = vpack.c.bf16 %v86_v22, %v85_v20  ;;  %v1991_v26 = vpack.c.bf16 %v72_v24, %v71_v23  ;;  %v55_v27 = vld [vmem:[%s3770_s1 + $0x20] sm:$0xff]  ;;  %v56_v28 = vld [vmem:[%s3770_s1 + $0x28] sm:$0xff]  ;;  %v73_v35 = vld [vmem:[%s3770_s1 + $0xb0] sm:$0xff] }
   0x8   :  { %v103_v29 = vld [vmem:[%s3770_s1 + $0x1a0] sm:$0xff]  ;;  %2020 = vmatprep.subr.bf16.mxu1 %v2019_v21  ;;  %v104_v30 = vld [vmem:[%s3770_s1 + $0x1a8] sm:$0xff]  ;;  %v1993_v33 = vpack.c.bf16 %v56_v28, %v55_v27  ;;  %v74_v36 = vld [vmem:[%s3770_s1 + $0xb8] sm:$0xff] }
   0x9   :  { %v87_v31 = vld [vmem:[%s3770_s1 + $0x120] sm:$0xff]  ;;  %v88_v32 = vld [vmem:[%s3770_s1 + $0x128] sm:$0xff]  ;;  %1990 = vmatpush3.bf16.msra.mxu0 %v1989_v17  ;;  %v2023_v34 = vpack.c.bf16 %v104_v30, %v103_v29  ;;  %v57_v37 = vld [vmem:[%s3770_s1 + $0x30] sm:$0xff]  ;;  %v1995_v39 = vpack.c.bf16 %v74_v36, %v73_v35 }
   0xa   :  { %1992 = vmatprep.subr.bf16.mxu0 %v1991_v26  ;;  %v2025_v38 = vpack.c.bf16 %v88_v32, %v87_v31  ;;  %v58_v40 = vld [vmem:[%s3770_s1 + $0x38] sm:$0xff]  ;;  %v105_v41 = vld [vmem:[%s3770_s1 + $0x1b0] sm:$0xff]  ;;  %v75_v46 = vld [vmem:[%s3770_s1 + $0xc0] sm:$0xff] }
   0xb   :  { %2022 = vmatpush3.bf16.msra.mxu1 %v2021_v25  ;;  %v106_v42 = vld [vmem:[%s3770_s1 + $0x1b8] sm:$0xff]  ;;  %v89_v44 = vld [vmem:[%s3770_s1 + $0x130] sm:$0xff]  ;;  %v76_v47 = vld [vmem:[%s3770_s1 + $0xc8] sm:$0xff]  ;;  %v1997_v48 = vpack.c.bf16 %v58_v40, %v57_v37 }
   0xc   :  { %2024 = vmatprep.subr.bf16.mxu1 %v2023_v34  ;;  %v2027_v43 = vpack.c.bf16 %v106_v42, %v105_v41  ;;  %v90_v45 = vld [vmem:[%s3770_s1 + $0x138] sm:$0xff]  ;;  %v107_v49 = vld [vmem:[%s3770_s1 + $0x1c0] sm:$0xff]  ;;  %v108_v50 = vld [vmem:[%s3770_s1 + $0x1c8] sm:$0xff]  ;;  %v1999_v52 = vpack.c.bf16 %v76_v47, %v75_v46 }
   0xd   :  { %1994 = vmatpush3.bf16.msra.mxu0 %v1993_v33  ;;  %v2029_v51 = vpack.c.bf16 %v90_v45, %v89_v44  ;;  %v59_v53 = vld [vmem:[%s3770_s1 + $0x40] sm:$0xff]  ;;  %v60_v54 = vld [vmem:[%s3770_s1 + $0x48] sm:$0xff]  ;;  %v2031_v56 = vpack.c.bf16 %v108_v50, %v107_v49  ;;  %v77_v58 = vld [vmem:[%s3770_s1 + $0xd0] sm:$0xff] }
   0xe   :  { %1996 = vmatprep.subr.bf16.mxu0 %v1995_v39  ;;  %v91_v55 = vld [vmem:[%s3770_s1 + $0x140] sm:$0xff]  ;;  %v92_v57 = vld [vmem:[%s3770_s1 + $0x148] sm:$0xff]  ;;  %v78_v59 = vld [vmem:[%s3770_s1 + $0xd8] sm:$0xff]  ;;  %v2001_v62 = vpack.c.bf16 %v60_v54, %v59_v53 }
   0xf   :  { %2026 = vmatpush3.bf16.msra.mxu1 %v2025_v38  ;;  %v109_v60 = vld [vmem:[%s3770_s1 + $0x1d0] sm:$0xff]  ;;  %v110_v61 = vld [vmem:[%s3770_s1 + $0x1d8] sm:$0xff]  ;;  %v2033_v63 = vpack.c.bf16 %v92_v57, %v91_v55  ;;  %v2003_v0 = vpack.c.bf16 %v78_v59, %v77_v58  ;;  %v79_v6 = vld [vmem:[%s3770_s1 + $0xe0] sm:$0xff] }
  0x10   :  { %2028 = vmatprep.subr.bf16.mxu1 %v2027_v43  ;;  %v61_v1 = vld [vmem:[%s3770_s1 + $0x50] sm:$0xff]  ;;  %v62_v2 = vld [vmem:[%s3770_s1 + $0x58] sm:$0xff]  ;;  %v2035_v4 = vpack.c.bf16 %v110_v61, %v109_v60  ;;  %v80_v7 = vld [vmem:[%s3770_s1 + $0xe8] sm:$0xff] }
  0x11   :  { %1998 = vmatpush3.bf16.msra.mxu0 %v1997_v48  ;;  %v93_v3 = vld [vmem:[%s3770_s1 + $0x150] sm:$0xff]  ;;  %v94_v5 = vld [vmem:[%s3770_s1 + $0x158] sm:$0xff]  ;;  %v111_v8 = vld [vmem:[%s3770_s1 + $0x1e0] sm:$0xff]  ;;  %v2005_v10 = vpack.c.bf16 %v62_v2, %v61_v1  ;;  %v2007_v14 = vpack.c.bf16 %v80_v7, %v79_v6 }
  0x12   :  { %2000 = vmatprep.subr.bf16.mxu0 %v1999_v52  ;;  %v112_v9 = vld [vmem:[%s3770_s1 + $0x1e8] sm:$0xff]  ;;  %v63_v11 = vld [vmem:[%s3770_s1 + $0x60] sm:$0xff]  ;;  %v2037_v13 = vpack.c.bf16 %v94_v5, %v93_v3  ;;  %v81_v19 = vld [vmem:[%s3770_s1 + $0xf0] sm:$0xff] }
  0x13   :  { %2030 = vmatpush3.bf16.msra.mxu1 %v2029_v51  ;;  %v64_v12 = vld [vmem:[%s3770_s1 + $0x68] sm:$0xff]  ;;  %v95_v15 = vld [vmem:[%s3770_s1 + $0x160] sm:$0xff]  ;;  %v2039_v18 = vpack.c.bf16 %v112_v9, %v111_v8  ;;  %v82_v20 = vld [vmem:[%s3770_s1 + $0xf8] sm:$0xff] }
  0x14   :  { %2032 = vmatprep.subr.bf16.mxu1 %v2031_v56  ;;  %v96_v16 = vld [vmem:[%s3770_s1 + $0x168] sm:$0xff]  ;;  %v30_v21 = vld [vmem:[%s3769_s0 + $0x18] sm:$0xff]  ;;  %v113_v22 = vld [vmem:[%s3770_s1 + $0x1f0] sm:$0xff]  ;;  %v2009_v24 = vpack.c.bf16 %v64_v12, %v63_v11  ;;  %v2011_v26 = vpack.c.bf16 %v82_v20, %v81_v19 }
  0x15   :  { %2002 = vmatpush3.bf16.msra.mxu0 %v2001_v62  ;;  %v28_v17 = vld [vmem:[%s3769_s0 + $0x8] sm:$0xff]  ;;  %v114_v23 = vld [vmem:[%s3770_s1 + $0x1f8] sm:$0xff]  ;;  %576 = vmatprep.mubr.f32.mxu1 %v30_v21  ;;  %v2041_v25 = vpack.c.bf16 %v96_v16, %v95_v15  ;;  %v65_v27 = vld [vmem:[%s3770_s1 + $0x70] sm:$0xff] }
  0x16   :  { %2004 = vmatprep.subr.bf16.mxu0 %v2003_v0  ;;  %506 = vmatprep.mubr.f32.mxu0 %v28_v17  ;;  %v66_v28 = vld [vmem:[%s3770_s1 + $0x78] sm:$0xff]  ;;  %v97_v29 = vld [vmem:[%s3770_s1 + $0x170] sm:$0xff]  ;;  %v2043_v30 = vpack.c.bf16 %v114_v23, %v113_v22  ;;  %v131_v32 = vld [vmem:[%s3770_s1 + $0x280] sm:$0xff] }
  0x17   :  { %2034 = vmatpush3.bf16.msra.mxu1 %v2033_v63  ;;  %v98_v31 = vld [vmem:[%s3770_s1 + $0x178] sm:$0xff]  ;;  %v132_v33 = vld [vmem:[%s3770_s1 + $0x288] sm:$0xff]  ;;  %v163_v34 = vld [vmem:[%s3770_s1 + $0x380] sm:$0xff]  ;;  %v2013_v36 = vpack.c.bf16 %v66_v28, %v65_v27 }
  0x18   :  { %2036 = vmatprep.subr.bf16.mxu1 %v2035_v4  ;;  %v164_v35 = vld [vmem:[%s3770_s1 + $0x388] sm:$0xff]  ;;  %v2045_v37 = vpack.c.bf16 %v98_v31, %v97_v29  ;;  %v2047_v38 = vpack.c.bf16 %v132_v33, %v131_v32  ;;  %v115_v39 = vld [vmem:[%s3770_s1 + $0x200] sm:$0xff]  ;;  %v133_v44 = vld [vmem:[%s3770_s1 + $0x290] sm:$0xff] }
  0x19   :  { %2006 = vmatpush3.bf16.msra.mxu0 %v2005_v10  ;;  %v116_v40 = vld [vmem:[%s3770_s1 + $0x208] sm:$0xff]  ;;  %v147_v41 = vld [vmem:[%s3770_s1 + $0x300] sm:$0xff]  ;;  %v2079_v42 = vpack.c.bf16 %v164_v35, %v163_v34  ;;  %v134_v45 = vld [vmem:[%s3770_s1 + $0x298] sm:$0xff] }
  0x1a   :  { %2008 = vmatprep.subr.bf16.mxu0 %v2007_v14  ;;  %v148_v43 = vld [vmem:[%s3770_s1 + $0x308] sm:$0xff]  ;;  %v165_v46 = vld [vmem:[%s3770_s1 + $0x390] sm:$0xff]  ;;  %v166_v47 = vld [vmem:[%s3770_s1 + $0x398] sm:$0xff]  ;;  %v2049_v49 = vpack.c.bf16 %v116_v40, %v115_v39  ;;  %v2051_v52 = vpack.c.bf16 %v134_v45, %v133_v44 }
  0x1b   :  { %2038 = vmatpush3.bf16.msra.mxu1 %v2037_v13  ;;  %v27_v48 = vld [vmem:[%s3769_s0] sm:$0xff]  ;;  %v29_v50 = vld [vmem:[%s3769_s0 + $0x10] sm:$0xff]  ;;  %v2081_v51 = vpack.c.bf16 %v148_v43, %v147_v41  ;;  %v118_v54 = vld [vmem:[%s3770_s1 + $0x218] sm:$0xff]  ;;  %v2083_v56 = vpack.c.bf16 %v166_v47, %v165_v46 }
  0x1c   :  { %2040 = vmatprep.subr.bf16.mxu1 %v2039_v18  ;;  %v117_v53 = vld [vmem:[%s3770_s1 + $0x210] sm:$0xff]  ;;  %v150_v57 = vld [vmem:[%s3770_s1 + $0x318] sm:$0xff]  ;;  %v135_v58 = vld [vmem:[%s3770_s1 + $0x2a0] sm:$0xff] }
  0x1d   :  { %2010 = vmatpush3.bf16.msra.mxu0 %v2009_v24  ;;  %v149_v55 = vld [vmem:[%s3770_s1 + $0x310] sm:$0xff]  ;;  %v136_v59 = vld [vmem:[%s3770_s1 + $0x2a8] sm:$0xff]  ;;  %v167_v60 = vld [vmem:[%s3770_s1 + $0x3a0] sm:$0xff]  ;;  %v2053_v62 = vpack.c.bf16 %v118_v54, %v117_v53 }
  0x1e   :  { %2012 = vmatprep.subr.bf16.mxu0 %v2011_v26  ;;  %v168_v61 = vld [vmem:[%s3770_s1 + $0x3a8] sm:$0xff]  ;;  %v2085_v63 = vpack.c.bf16 %v150_v57, %v149_v55  ;;  %v2055_v0 = vpack.c.bf16 %v136_v59, %v135_v58  ;;  %v119_v1 = vld [vmem:[%s3770_s1 + $0x220] sm:$0xff]  ;;  %v137_v6 = vld [vmem:[%s3770_s1 + $0x2b0] sm:$0xff] }
  0x1f   :  { %2042 = vmatpush3.bf16.msra.mxu1 %v2041_v25  ;;  %v120_v2 = vld [vmem:[%s3770_s1 + $0x228] sm:$0xff]  ;;  %v151_v3 = vld [vmem:[%s3770_s1 + $0x320] sm:$0xff]  ;;  %v2087_v4 = vpack.c.bf16 %v168_v61, %v167_v60  ;;  %v138_v7 = vld [vmem:[%s3770_s1 + $0x2b8] sm:$0xff] }
  0x20   :  { %2044 = vmatprep.subr.bf16.mxu1 %v2043_v30  ;;  %v152_v5 = vld [vmem:[%s3770_s1 + $0x328] sm:$0xff]  ;;  %v169_v8 = vld [vmem:[%s3770_s1 + $0x3b0] sm:$0xff]  ;;  %v170_v9 = vld [vmem:[%s3770_s1 + $0x3b8] sm:$0xff]  ;;  %v2057_v10 = vpack.c.bf16 %v120_v2, %v119_v1  ;;  %v2059_v12 = vpack.c.bf16 %v138_v7, %v137_v6 }
  0x21   :  { %2014 = vmatpush3.bf16.msra.mxu0 %v2013_v36  ;;  %v2089_v11 = vpack.c.bf16 %v152_v5, %v151_v3  ;;  %v121_v13 = vld [vmem:[%s3770_s1 + $0x230] sm:$0xff]  ;;  %v122_v14 = vld [vmem:[%s3770_s1 + $0x238] sm:$0xff]  ;;  %v2091_v16 = vpack.c.bf16 %v170_v9, %v169_v8  ;;  %v139_v18 = vld [vmem:[%s3770_s1 + $0x2c0] sm:$0xff] }
  0x22   :  { %2048 = vmatprep.subr.bf16.mxu0 %v2047_v38  ;;  %v153_v15 = vld [vmem:[%s3770_s1 + $0x330] sm:$0xff]  ;;  %v154_v17 = vld [vmem:[%s3770_s1 + $0x338] sm:$0xff]  ;;  %v140_v19 = vld [vmem:[%s3770_s1 + $0x2c8] sm:$0xff]  ;;  %v2061_v22 = vpack.c.bf16 %v122_v14, %v121_v13 }
  0x23   :  { %2046 = vmatpush3.bf16.msra.mxu1 %v2045_v37  ;;  %v171_v20 = vld [vmem:[%s3770_s1 + $0x3c0] sm:$0xff]  ;;  %v172_v21 = vld [vmem:[%s3770_s1 + $0x3c8] sm:$0xff]  ;;  %v2093_v25 = vpack.c.bf16 %v154_v17, %v153_v15  ;;  %v2063_v26 = vpack.c.bf16 %v140_v19, %v139_v18  ;;  %v34_v29 = vld [vmem:[%s3769_s0 + $0x38] sm:$0xff] }
  0x24   :  { %2080 = vmatprep.subr.bf16.mxu1 %v2079_v42  ;;  %507 = vmatmul.mubr.f32.vlgmr.msra.gmra.mrb[0].mxu0 %v27_v48  ;;  %v123_v23 = vld [vmem:[%s3770_s1 + $0x240] sm:$0xff]  ;;  %v32_v24 = vld [vmem:[%s3769_s0 + $0x28] sm:$0xff]  ;;  %v2095_v30 = vpack.c.bf16 %v172_v21, %v171_v20  ;;  %v141_v32 = vld [vmem:[%s3770_s1 + $0x2d0] sm:$0xff] }
  0x25   :  { %2050 = vmatpush3.bf16.msra.mxu0 %v2049_v49  ;;  %v124_v27 = vld [vmem:[%s3770_s1 + $0x248] sm:$0xff]  ;;  %v155_v28 = vld [vmem:[%s3770_s1 + $0x340] sm:$0xff]  ;;  %v142_v33 = vld [vmem:[%s3770_s1 + $0x2d8] sm:$0xff]  ;;  %646 = vmatprep.mubr.f32.mxu0 %v32_v24 }
  0x26   :  { %577 = vmatmul.mubr.f32.vlgmr.msra.gmra.mrb[0].mxu1 %v29_v50  ;;  %2052 = vmatprep.subr.bf16.mxu0 %v2051_v52  ;;  %v156_v31 = vld [vmem:[%s3770_s1 + $0x348] sm:$0xff]  ;;  %v173_v34 = vld [vmem:[%s3770_s1 + $0x3d0] sm:$0xff]  ;;  %v174_v35 = vld [vmem:[%s3770_s1 + $0x3d8] sm:$0xff]  ;;  %v2065_v36 = vpack.c.bf16 %v124_v27, %v123_v23  ;;  %v2067_v38 = vpack.c.bf16 %v142_v33, %v141_v32 }
  0x27   :  { %2082 = vmatpush3.bf16.msra.mxu1 %v2081_v51  ;;  %716 = vmatprep.mubr.f32.mxu1 %v34_v29  ;;  %v2097_v37 = vpack.c.bf16 %v156_v31, %v155_v28  ;;  %v125_v39 = vld [vmem:[%s3770_s1 + $0x250] sm:$0xff]  ;;  %v126_v40 = vld [vmem:[%s3770_s1 + $0x258] sm:$0xff]  ;;  %v2099_v42 = vpack.c.bf16 %v174_v35, %v173_v34  ;;  %v143_v44 = vld [vmem:[%s3770_s1 + $0x2e0] sm:$0xff] }
  0x28   :  { %2084 = vmatprep.subr.bf16.mxu1 %v2083_v56  ;;  %v157_v41 = vld [vmem:[%s3770_s1 + $0x350] sm:$0xff]  ;;  %v158_v43 = vld [vmem:[%s3770_s1 + $0x358] sm:$0xff]  ;;  %v144_v45 = vld [vmem:[%s3770_s1 + $0x2e8] sm:$0xff]  ;;  %v2069_v48 = vpack.c.bf16 %v126_v40, %v125_v39 }
  0x29   :  { %2054 = vmatpush3.bf16.msra.mxu0 %v2053_v62  ;;  %v175_v46 = vld [vmem:[%s3770_s1 + $0x3e0] sm:$0xff]  ;;  %v176_v47 = vld [vmem:[%s3770_s1 + $0x3e8] sm:$0xff]  ;;  %v2101_v49 = vpack.c.bf16 %v158_v43, %v157_v41  ;;  %v2071_v50 = vpack.c.bf16 %v144_v45, %v143_v44  ;;  %v145_v56 = vld [vmem:[%s3770_s1 + $0x2f0] sm:$0xff] }
  0x2a   :  { %2056 = vmatprep.subr.bf16.mxu0 %v2055_v0  ;;  %v127_v51 = vld [vmem:[%s3770_s1 + $0x260] sm:$0xff]  ;;  %v128_v52 = vld [vmem:[%s3770_s1 + $0x268] sm:$0xff]  ;;  %v2103_v54 = vpack.c.bf16 %v176_v47, %v175_v46  ;;  %v146_v57 = vld [vmem:[%s3770_s1 + $0x2f8] sm:$0xff] }
  0x2b   :  { %2086 = vmatpush3.bf16.msra.mxu1 %v2085_v63  ;;  %v159_v53 = vld [vmem:[%s3770_s1 + $0x360] sm:$0xff]  ;;  %v160_v55 = vld [vmem:[%s3770_s1 + $0x368] sm:$0xff]  ;;  %v177_v58 = vld [vmem:[%s3770_s1 + $0x3f0] sm:$0xff]  ;;  %v2073_v60 = vpack.c.bf16 %v128_v52, %v127_v51  ;;  %v2075_v62 = vpack.c.bf16 %v146_v57, %v145_v56 }
  0x2c   :  { %2088 = vmatprep.subr.bf16.mxu1 %v2087_v4  ;;  %v178_v59 = vld [vmem:[%s3770_s1 + $0x3f8] sm:$0xff]  ;;  %v2105_v61 = vpack.c.bf16 %v160_v55, %v159_v53  ;;  %v129_v63 = vld [vmem:[%s3770_s1 + $0x270] sm:$0xff]  ;;  %v195_v4 = vld [vmem:[%s3770_s1 + $0x480] sm:$0xff] }
  0x2d   :  { %2058 = vmatpush3.bf16.msra.mxu0 %v2057_v10  ;;  %v130_v0 = vld [vmem:[%s3770_s1 + $0x278] sm:$0xff]  ;;  %v161_v1 = vld [vmem:[%s3770_s1 + $0x370] sm:$0xff]  ;;  %v2107_v2 = vpack.c.bf16 %v178_v59, %v177_v58  ;;  %v196_v5 = vld [vmem:[%s3770_s1 + $0x488] sm:$0xff] }
  0x2e   :  { %2060 = vmatprep.subr.bf16.mxu0 %v2059_v12  ;;  %v162_v3 = vld [vmem:[%s3770_s1 + $0x378] sm:$0xff]  ;;  %v227_v6 = vld [vmem:[%s3770_s1 + $0x580] sm:$0xff]  ;;  %v228_v7 = vld [vmem:[%s3770_s1 + $0x588] sm:$0xff]  ;;  %v2077_v8 = vpack.c.bf16 %v130_v0, %v129_v63  ;;  %v2111_v10 = vpack.c.bf16 %v196_v5, %v195_v4 }
  0x2f   :  { %2090 = vmatpush3.bf16.msra.mxu1 %v2089_v11  ;;  %v2109_v9 = vpack.c.bf16 %v162_v3, %v161_v1  ;;  %v179_v11 = vld [vmem:[%s3770_s1 + $0x400] sm:$0xff]  ;;  %v180_v12 = vld [vmem:[%s3770_s1 + $0x408] sm:$0xff]  ;;  %v2143_v14 = vpack.c.bf16 %v228_v7, %v227_v6  ;;  %v198_v17 = vld [vmem:[%s3770_s1 + $0x498] sm:$0xff] }
  0x30   :  { %2092 = vmatprep.subr.bf16.mxu1 %v2091_v16  ;;  %v211_v13 = vld [vmem:[%s3770_s1 + $0x500] sm:$0xff]  ;;  %v212_v15 = vld [vmem:[%s3770_s1 + $0x508] sm:$0xff]  ;;  %v197_v16 = vld [vmem:[%s3770_s1 + $0x490] sm:$0xff]  ;;  %v2113_v21 = vpack.c.bf16 %v180_v12, %v179_v11 }
  0x31   :  { %2062 = vmatpush3.bf16.msra.mxu0 %v2061_v22  ;;  %v229_v18 = vld [vmem:[%s3770_s1 + $0x590] sm:$0xff]  ;;  %v230_v19 = vld [vmem:[%s3770_s1 + $0x598] sm:$0xff]  ;;  %v31_v20 = vld [vmem:[%s3769_s0 + $0x20] sm:$0xff]  ;;  %v2145_v23 = vpack.c.bf16 %v212_v15, %v211_v13  ;;  %v2115_v24 = vpack.c.bf16 %v198_v17, %v197_v16 }
  0x32   :  { %2064 = vmatprep.subr.bf16.mxu0 %v2063_v26  ;;  %v33_v22 = vld [vmem:[%s3769_s0 + $0x30] sm:$0xff]  ;;  %v182_v26 = vld [vmem:[%s3770_s1 + $0x418] sm:$0xff]  ;;  %v2147_v28 = vpack.c.bf16 %v230_v19, %v229_v18  ;;  %v200_v31 = vld [vmem:[%s3770_s1 + $0x4a8] sm:$0xff] }
  0x33   :  { %2094 = vmatpush3.bf16.msra.mxu1 %v2093_v25  ;;  %v181_v25 = vld [vmem:[%s3770_s1 + $0x410] sm:$0xff]  ;;  %v214_v29 = vld [vmem:[%s3770_s1 + $0x518] sm:$0xff]  ;;  %v231_v32 = vld [vmem:[%s3770_s1 + $0x5a0] sm:$0xff] }
  0x34   :  { %2096 = vmatprep.subr.bf16.mxu1 %v2095_v30  ;;  %v213_v27 = vld [vmem:[%s3770_s1 + $0x510] sm:$0xff]  ;;  %v199_v30 = vld [vmem:[%s3770_s1 + $0x4a0] sm:$0xff]  ;;  %v232_v33 = vld [vmem:[%s3770_s1 + $0x5a8] sm:$0xff]  ;;  %v2117_v35 = vpack.c.bf16 %v182_v26, %v181_v25 }
  0x35   :  { %2066 = vmatpush3.bf16.msra.mxu0 %v2065_v36  ;;  %v36_v34 = vld [vmem:[%s3769_s0 + $0x48] sm:$0xff]  ;;  %v38_v36 = vld [vmem:[%s3769_s0 + $0x58] sm:$0xff]  ;;  %v183_v39 = vld [vmem:[%s3770_s1 + $0x420] sm:$0xff] }
  0x36   :  { %2068 = vmatprep.subr.bf16.mxu0 %v2067_v38  ;;  %v2119_v38 = vpack.c.bf16 %v200_v31, %v199_v30  ;;  %v184_v40 = vld [vmem:[%s3770_s1 + $0x428] sm:$0xff]  ;;  %v215_v41 = vld [vmem:[%s3770_s1 + $0x520] sm:$0xff]  ;;  %v201_v44 = vld [vmem:[%s3770_s1 + $0x4b0] sm:$0xff] }
  0x37   :  { %2098 = vmatpush3.bf16.msra.mxu1 %v2097_v37  ;;  %v2149_v37 = vpack.c.bf16 %v214_v29, %v213_v27  ;;  %v216_v43 = vld [vmem:[%s3770_s1 + $0x528] sm:$0xff]  ;;  %v202_v45 = vld [vmem:[%s3770_s1 + $0x4b8] sm:$0xff]  ;;  %v233_v46 = vld [vmem:[%s3770_s1 + $0x5b0] sm:$0xff] }
  0x38   :  { %2100 = vmatprep.subr.bf16.mxu1 %v2099_v42  ;;  %v2151_v42 = vpack.c.bf16 %v232_v33, %v231_v32  ;;  %v234_v47 = vld [vmem:[%s3770_s1 + $0x5b8] sm:$0xff]  ;;  %v185_v51 = vld [vmem:[%s3770_s1 + $0x430] sm:$0xff]  ;;  %v203_v56 = vld [vmem:[%s3770_s1 + $0x4c0] sm:$0xff] }
  0x39   :  { %2070 = vmatpush3.bf16.msra.mxu0 %v2069_v48  ;;  %v2121_v48 = vpack.c.bf16 %v184_v40, %v183_v39  ;;  %v186_v52 = vld [vmem:[%s3770_s1 + $0x438] sm:$0xff]  ;;  %v217_v53 = vld [vmem:[%s3770_s1 + $0x530] sm:$0xff]  ;;  %v204_v57 = vld [vmem:[%s3770_s1 + $0x4c8] sm:$0xff] }
  0x3a   :  { %2072 = vmatprep.subr.bf16.mxu0 %v2071_v50  ;;  %v2123_v50 = vpack.c.bf16 %v202_v45, %v201_v44  ;;  %v218_v55 = vld [vmem:[%s3770_s1 + $0x538] sm:$0xff]  ;;  %v235_v58 = vld [vmem:[%s3770_s1 + $0x5c0] sm:$0xff]  ;;  %v236_v59 = vld [vmem:[%s3770_s1 + $0x5c8] sm:$0xff] }
  0x3b   :  { %2102 = vmatpush3.bf16.msra.mxu1 %v2101_v49  ;;  %v2153_v49 = vpack.c.bf16 %v216_v43, %v215_v41  ;;  %v187_v63 = vld [vmem:[%s3770_s1 + $0x440] sm:$0xff]  ;;  %v188_v0 = vld [vmem:[%s3770_s1 + $0x448] sm:$0xff]  ;;  %v205_v4 = vld [vmem:[%s3770_s1 + $0x4d0] sm:$0xff] }
  0x3c   :  { %2104 = vmatprep.subr.bf16.mxu1 %v2103_v54  ;;  %v2155_v54 = vpack.c.bf16 %v234_v47, %v233_v46  ;;  %v219_v1 = vld [vmem:[%s3770_s1 + $0x540] sm:$0xff]  ;;  %v220_v3 = vld [vmem:[%s3770_s1 + $0x548] sm:$0xff]  ;;  %v206_v5 = vld [vmem:[%s3770_s1 + $0x4d8] sm:$0xff] }
  0x3d   :  { %2074 = vmatpush3.bf16.msra.mxu0 %v2073_v60  ;;  %v2125_v60 = vpack.c.bf16 %v186_v52, %v185_v51  ;;  %v237_v6 = vld [vmem:[%s3770_s1 + $0x5d0] sm:$0xff]  ;;  %v238_v7 = vld [vmem:[%s3770_s1 + $0x5d8] sm:$0xff]  ;;  %v207_v16 = vld [vmem:[%s3770_s1 + $0x4e0] sm:$0xff] }
  0x3e   :  { %2076 = vmatprep.subr.bf16.mxu0 %v2075_v62  ;;  %v2127_v62 = vpack.c.bf16 %v204_v57, %v203_v56  ;;  %v189_v11 = vld [vmem:[%s3770_s1 + $0x450] sm:$0xff]  ;;  %v190_v12 = vld [vmem:[%s3770_s1 + $0x458] sm:$0xff]  ;;  %v208_v17 = vld [vmem:[%s3770_s1 + $0x4e8] sm:$0xff] }
  0x3f   :  { %2106 = vmatpush3.bf16.msra.mxu1 %v2105_v61  ;;  %v2157_v61 = vpack.c.bf16 %v218_v55, %v217_v53  ;;  %v221_v13 = vld [vmem:[%s3770_s1 + $0x550] sm:$0xff]  ;;  %v222_v15 = vld [vmem:[%s3770_s1 + $0x558] sm:$0xff]  ;;  %v239_v18 = vld [vmem:[%s3770_s1 + $0x5e0] sm:$0xff] }
  0x40   :  { %2108 = vmatprep.subr.bf16.mxu1 %v2107_v2  ;;  %v2159_v2 = vpack.c.bf16 %v236_v59, %v235_v58  ;;  %v240_v19 = vld [vmem:[%s3770_s1 + $0x5e8] sm:$0xff]  ;;  %v223_v25 = vld [vmem:[%s3770_s1 + $0x560] sm:$0xff]  ;;  %v210_v29 = vld [vmem:[%s3770_s1 + $0x4f8] sm:$0xff] }
  0x41   :  { %2078 = vmatpush3.bf16.msra.mxu0 %v2077_v8  ;;  %v2129_v8 = vpack.c.bf16 %v188_v0, %v187_v63  ;;  %v2167_v26 = vpack.c.bf16 %v240_v19, %v239_v18  ;;  %v224_v27 = vld [vmem:[%s3770_s1 + $0x568] sm:$0xff]  ;;  %v241_v30 = vld [vmem:[%s3770_s1 + $0x5f0] sm:$0xff]  ;;  %v242_v31 = vld [vmem:[%s3770_s1 + $0x5f8] sm:$0xff] }
  0x42   :  { %2112 = vmatprep.subr.bf16.mxu0 %v2111_v10  ;;  %v2131_v10 = vpack.c.bf16 %v206_v5, %v205_v4  ;;  %v2169_v33 = vpack.c.bf16 %v224_v27, %v223_v25  ;;  %v226_v39 = vld [vmem:[%s3770_s1 + $0x578] sm:$0xff]  ;;  %v259_v40 = vld [vmem:[%s3770_s1 + $0x680] sm:$0xff]  ;;  %v260_v41 = vld [vmem:[%s3770_s1 + $0x688] sm:$0xff] }
  0x43   :  { %2110 = vmatpush3.bf16.msra.mxu1 %v2109_v9  ;;  %v2161_v9 = vpack.c.bf16 %v220_v3, %v219_v1  ;;  %v292_v43 = vld [vmem:[%s3770_s1 + $0x788] sm:$0xff]  ;;  %v2175_v46 = vpack.c.bf16 %v260_v41, %v259_v40  ;;  %v243_v47 = vld [vmem:[%s3770_s1 + $0x600] sm:$0xff]  ;;  %v261_v52 = vld [vmem:[%s3770_s1 + $0x690] sm:$0xff] }
  0x44   :  { %2144 = vmatprep.subr.bf16.mxu1 %v2143_v14  ;;  %647 = vmatmul.mubr.f32.vlgmr.msra.gmra.mrb[2].mxu0 %v31_v20  ;;  %v2163_v14 = vpack.c.bf16 %v238_v7, %v237_v6  ;;  %v2133_v20 = vpack.c.bf16 %v190_v12, %v189_v11  ;;  %v276_v51 = vld [vmem:[%s3770_s1 + $0x708] sm:$0xff]  ;;  %v262_v53 = vld [vmem:[%s3770_s1 + $0x698] sm:$0xff]  ;;  %v35_v56 = vld [vmem:[%s3769_s0 + $0x40] sm:$0xff] }
  0x45   :  { %2114 = vmatpush3.bf16.msra.mxu0 %v2113_v21  ;;  %786 = vmatprep.mubr.f32.mxu0 %v36_v34  ;;  %v2165_v21 = vpack.c.bf16 %v222_v15, %v221_v13  ;;  %v294_v55 = vld [vmem:[%s3770_s1 + $0x798] sm:$0xff]  ;;  %v37_v58 = vld [vmem:[%s3769_s0 + $0x50] sm:$0xff]  ;;  %v264_v3 = vld [vmem:[%s3770_s1 + $0x6a8] sm:$0xff] }
  0x46   :  { %717 = vmatmul.mubr.f32.vlgmr.msra.gmra.mrb[2].mxu1 %v33_v22  ;;  %2116 = vmatprep.subr.bf16.mxu0 %v2115_v24  ;;  %v2135_v22 = vpack.c.bf16 %v208_v17, %v207_v16  ;;  %v192_v24 = vld [vmem:[%s3770_s1 + $0x468] sm:$0xff]  ;;  %v277_v63 = vld [vmem:[%s3770_s1 + $0x710] sm:$0xff]  ;;  %v278_v1 = vld [vmem:[%s3770_s1 + $0x718] sm:$0xff] }
  0x47   :  { %2146 = vmatpush3.bf16.msra.mxu1 %v2145_v23  ;;  %856 = vmatprep.mubr.f32.mxu1 %v38_v36  ;;  %v191_v23 = vld [vmem:[%s3770_s1 + $0x460] sm:$0xff]  ;;  %v194_v36 = vld [vmem:[%s3770_s1 + $0x478] sm:$0xff]  ;;  %v296_v5 = vld [vmem:[%s3770_s1 + $0x7a8] sm:$0xff] }
  0x48   :  { %2148 = vmatprep.subr.bf16.mxu1 %v2147_v28  ;;  %v209_v28 = vld [vmem:[%s3770_s1 + $0x4f0] sm:$0xff]  ;;  %v2137_v32 = vpack.c.bf16 %v192_v24, %v191_v23  ;;  %v295_v4 = vld [vmem:[%s3770_s1 + $0x7a0] sm:$0xff]  ;;  %v40_v6 = vld [vmem:[%s3769_s0 + $0x68] sm:$0xff] }
  0x49   :  { %2118 = vmatpush3.bf16.msra.mxu0 %v2117_v35  ;;  %v2139_v34 = vpack.c.bf16 %v210_v29, %v209_v28  ;;  %v193_v35 = vld [vmem:[%s3770_s1 + $0x470] sm:$0xff]  ;;  %v247_v11 = vld [vmem:[%s3770_s1 + $0x620] sm:$0xff]  ;;  %v248_v12 = vld [vmem:[%s3770_s1 + $0x628] sm:$0xff] }
  0x4a   :  { %2120 = vmatprep.subr.bf16.mxu0 %v2119_v38  ;;  %v2171_v38 = vpack.c.bf16 %v242_v31, %v241_v30  ;;  %v2141_v44 = vpack.c.bf16 %v194_v36, %v193_v35  ;;  %v279_v13 = vld [vmem:[%s3770_s1 + $0x720] sm:$0xff]  ;;  %v280_v15 = vld [vmem:[%s3770_s1 + $0x728] sm:$0xff]  ;;  %v265_v16 = vld [vmem:[%s3770_s1 + $0x6b0] sm:$0xff] }
  0x4b   :  { %2150 = vmatpush3.bf16.msra.mxu1 %v2149_v37  ;;  %v225_v37 = vld [vmem:[%s3770_s1 + $0x570] sm:$0xff]  ;;  %v266_v17 = vld [vmem:[%s3770_s1 + $0x6b8] sm:$0xff]  ;;  %v267_v28 = vld [vmem:[%s3770_s1 + $0x6c0] sm:$0xff] }
  0x4c   :  { %2152 = vmatprep.subr.bf16.mxu1 %v2151_v42  ;;  %v291_v42 = vld [vmem:[%s3770_s1 + $0x780] sm:$0xff]  ;;  %v2173_v45 = vpack.c.bf16 %v226_v39, %v225_v37  ;;  %v297_v18 = vld [vmem:[%s3770_s1 + $0x7b0] sm:$0xff]  ;;  %v298_v19 = vld [vmem:[%s3770_s1 + $0x7b8] sm:$0xff] }
  0x4d   :  { %2122 = vmatpush3.bf16.msra.mxu0 %v2121_v48  ;;  %v244_v48 = vld [vmem:[%s3770_s1 + $0x608] sm:$0xff]  ;;  %v249_v23 = vld [vmem:[%s3770_s1 + $0x630] sm:$0xff]  ;;  %v250_v24 = vld [vmem:[%s3770_s1 + $0x638] sm:$0xff] }
  0x4e   :  { %2124 = vmatprep.subr.bf16.mxu0 %v2123_v50  ;;  %v2207_v50 = vpack.c.bf16 %v292_v43, %v291_v42  ;;  %v2177_v57 = vpack.c.bf16 %v244_v48, %v243_v47  ;;  %v281_v25 = vld [vmem:[%s3770_s1 + $0x730] sm:$0xff]  ;;  %v282_v27 = vld [vmem:[%s3770_s1 + $0x738] sm:$0xff]  ;;  %v268_v29 = vld [vmem:[%s3770_s1 + $0x6c8] sm:$0xff] }
  0x4f   :  { %2154 = vmatpush3.bf16.msra.mxu1 %v2153_v49  ;;  %v275_v49 = vld [vmem:[%s3770_s1 + $0x700] sm:$0xff]  ;;  %v300_v31 = vld [vmem:[%s3770_s1 + $0x7c8] sm:$0xff]  ;;  %v269_v40 = vld [vmem:[%s3770_s1 + $0x6d0] sm:$0xff] }
  0x50   :  { %2156 = vmatprep.subr.bf16.mxu1 %v2155_v54  ;;  %v293_v54 = vld [vmem:[%s3770_s1 + $0x790] sm:$0xff]  ;;  %v2209_v59 = vpack.c.bf16 %v276_v51, %v275_v49  ;;  %v299_v30 = vld [vmem:[%s3770_s1 + $0x7c0] sm:$0xff]  ;;  %v252_v36 = vld [vmem:[%s3770_s1 + $0x648] sm:$0xff] }
  0x51   :  { %2126 = vmatpush3.bf16.msra.mxu0 %v2125_v60  ;;  %v2179_v60 = vpack.c.bf16 %v262_v53, %v261_v52  ;;  %v2211_v0 = vpack.c.bf16 %v294_v55, %v293_v54  ;;  %v251_v35 = vld [vmem:[%s3770_s1 + $0x640] sm:$0xff]  ;;  %v284_v39 = vld [vmem:[%s3770_s1 + $0x748] sm:$0xff]  ;;  %v270_v41 = vld [vmem:[%s3770_s1 + $0x6d8] sm:$0xff] }
  0x52   :  { %2128 = vmatprep.subr.bf16.mxu0 %v2127_v62  ;;  %v246_v62 = vld [vmem:[%s3770_s1 + $0x618] sm:$0xff]  ;;  %v283_v37 = vld [vmem:[%s3770_s1 + $0x740] sm:$0xff]  ;;  %v301_v42 = vld [vmem:[%s3770_s1 + $0x7d0] sm:$0xff] }
  0x53   :  { %2158 = vmatpush3.bf16.msra.mxu1 %v2157_v61  ;;  %v245_v61 = vld [vmem:[%s3770_s1 + $0x610] sm:$0xff]  ;;  %v302_v43 = vld [vmem:[%s3770_s1 + $0x7d8] sm:$0xff]  ;;  %v271_v52 = vld [vmem:[%s3770_s1 + $0x6e0] sm:$0xff] }
  0x54   :  { %2160 = vmatprep.subr.bf16.mxu1 %v2159_v2  ;;  %v263_v2 = vld [vmem:[%s3770_s1 + $0x6a0] sm:$0xff]  ;;  %v2181_v7 = vpack.c.bf16 %v246_v62, %v245_v61  ;;  %v253_v47 = vld [vmem:[%s3770_s1 + $0x650] sm:$0xff]  ;;  %v254_v48 = vld [vmem:[%s3770_s1 + $0x658] sm:$0xff] }
  0x55   :  { %2130 = vmatpush3.bf16.msra.mxu0 %v2129_v8  ;;  %v42_v8 = vld [vmem:[%s3769_s0 + $0x78] sm:$0xff]  ;;  %v285_v49 = vld [vmem:[%s3770_s1 + $0x750] sm:$0xff]  ;;  %v272_v53 = vld [vmem:[%s3770_s1 + $0x6e8] sm:$0xff] }
  0x56   :  { %2132 = vmatprep.subr.bf16.mxu0 %v2131_v10  ;;  %v2183_v10 = vpack.c.bf16 %v264_v3, %v263_v2  ;;  %v286_v51 = vld [vmem:[%s3770_s1 + $0x758] sm:$0xff]  ;;  %v303_v54 = vld [vmem:[%s3770_s1 + $0x7e0] sm:$0xff]  ;;  %v304_v55 = vld [vmem:[%s3770_s1 + $0x7e8] sm:$0xff] }
  0x57   :  { %2162 = vmatpush3.bf16.msra.mxu1 %v2161_v9  ;;  %v2213_v9 = vpack.c.bf16 %v278_v1, %v277_v63  ;;  %v287_v61 = vld [vmem:[%s3770_s1 + $0x760] sm:$0xff]  ;;  %v2231_v62 = vpack.c.bf16 %v304_v55, %v303_v54  ;;  %v288_v63 = vld [vmem:[%s3770_s1 + $0x768] sm:$0xff]  ;;  %v274_v1 = vld [vmem:[%s3770_s1 + $0x6f8] sm:$0xff] }
  0x58   :  { %2164 = vmatprep.subr.bf16.mxu1 %v2163_v14  ;;  %v2215_v14 = vpack.c.bf16 %v296_v5, %v295_v4  ;;  %v305_v2 = vld [vmem:[%s3770_s1 + $0x7f0] sm:$0xff]  ;;  %v306_v3 = vld [vmem:[%s3770_s1 + $0x7f8] sm:$0xff]  ;;  %v2233_v5 = vpack.c.bf16 %v288_v63, %v287_v61 }
  0x59   :  { %2134 = vmatpush3.bf16.msra.mxu0 %v2133_v20  ;;  %v2185_v20 = vpack.c.bf16 %v248_v12, %v247_v11  ;;  %v290_v11 = vld [vmem:[%s3770_s1 + $0x778] sm:$0xff]  ;;  %v323_v12 = vld [vmem:[%s3770_s1 + $0x880] sm:$0xff]  ;;  %v361_v54 = vld [vmem:[%s3770_s1 + $0x9b0] sm:$0xff] }
  0x5a   :  { %2136 = vmatprep.subr.bf16.mxu0 %v2135_v22  ;;  %v2187_v22 = vpack.c.bf16 %v266_v17, %v265_v16  ;;  %v362_v55 = vld [vmem:[%s3770_s1 + $0x9b8] sm:$0xff] }
  0x5b   :  { %2166 = vmatpush3.bf16.msra.mxu1 %v2165_v21  ;;  %v2217_v21 = vpack.c.bf16 %v280_v15, %v279_v13  ;;  %v324_v13 = vld [vmem:[%s3770_s1 + $0x888] sm:$0xff] }
  0x5c   :  { %2168 = vmatprep.subr.bf16.mxu1 %v2167_v26  ;;  %v2219_v26 = vpack.c.bf16 %v298_v19, %v297_v18  ;;  %v356_v15 = vld [vmem:[%s3770_s1 + $0x988] sm:$0xff]  ;;  %v2239_v18 = vpack.c.bf16 %v324_v13, %v323_v12  ;;  %v307_v19 = vld [vmem:[%s3770_s1 + $0x800] sm:$0xff] }
  0x5d   :  { %2138 = vmatpush3.bf16.msra.mxu0 %v2137_v32  ;;  %v2189_v32 = vpack.c.bf16 %v250_v24, %v249_v23  ;;  %v340_v23 = vld [vmem:[%s3770_s1 + $0x908] sm:$0xff]  ;;  %v325_v24 = vld [vmem:[%s3770_s1 + $0x890] sm:$0xff] }
  0x5e   :  { %2140 = vmatprep.subr.bf16.mxu0 %v2139_v34  ;;  %v2191_v34 = vpack.c.bf16 %v268_v29, %v267_v28  ;;  %v39_v28 = vld [vmem:[%s3769_s0 + $0x60] sm:$0xff] }
  0x5f   :  { %2170 = vmatpush3.bf16.msra.mxu1 %v2169_v33  ;;  %v2221_v33 = vpack.c.bf16 %v282_v27, %v281_v25  ;;  %v326_v25 = vld [vmem:[%s3770_s1 + $0x898] sm:$0xff] }
  0x60   :  { %2172 = vmatprep.subr.bf16.mxu1 %v2171_v38  ;;  %v2223_v38 = vpack.c.bf16 %v300_v31, %v299_v30  ;;  %v358_v27 = vld [vmem:[%s3770_s1 + $0x998] sm:$0xff]  ;;  %v41_v30 = vld [vmem:[%s3769_s0 + $0x70] sm:$0xff] }
  0x61   :  { %2142 = vmatpush3.bf16.msra.mxu0 %v2141_v44  ;;  %v2193_v44 = vpack.c.bf16 %v252_v36, %v251_v35  ;;  %v341_v35 = vld [vmem:[%s3770_s1 + $0x910] sm:$0xff] }
  0x62   :  { %2176 = vmatprep.subr.bf16.mxu0 %v2175_v46  ;;  %v2195_v46 = vpack.c.bf16 %v270_v41, %v269_v40  ;;  %v359_v40 = vld [vmem:[%s3770_s1 + $0x9a0] sm:$0xff]  ;;  %v360_v41 = vld [vmem:[%s3770_s1 + $0x9a8] sm:$0xff] }
  0x63   :  { %2174 = vmatpush3.bf16.msra.mxu1 %v2173_v45  ;;  %v2225_v45 = vpack.c.bf16 %v284_v39, %v283_v37  ;;  %v342_v37 = vld [vmem:[%s3770_s1 + $0x918] sm:$0xff]  ;;  %v328_v39 = vld [vmem:[%s3770_s1 + $0x8a8] sm:$0xff] }
  0x64   :  { %2208 = vmatprep.subr.bf16.mxu1 %v2207_v50  ;;  %787 = vmatmul.mubr.f32.vlgmr.msra.gmra.mrb[4].mxu0 %v35_v56  ;;  %v2227_v50 = vpack.c.bf16 %v302_v43, %v301_v42  ;;  %v2197_v56 = vpack.c.bf16 %v254_v48, %v253_v47  ;;  %v44_v42 = vld [vmem:[%s3769_s0 + $0x88] sm:$0xff]  ;;  %v311_v47 = vld [vmem:[%s3770_s1 + $0x820] sm:$0xff] }
  0x65   :  { %2178 = vmatpush3.bf16.msra.mxu0 %v2177_v57  ;;  %926 = vmatprep.mubr.f32.mxu0 %v40_v6  ;;  %v2229_v57 = vpack.c.bf16 %v286_v51, %v285_v49  ;;  %v312_v48 = vld [vmem:[%s3770_s1 + $0x828] sm:$0xff]  ;;  %v343_v49 = vld [vmem:[%s3770_s1 + $0x920] sm:$0xff] }
  0x66   :  { %857 = vmatmul.mubr.f32.vlgmr.msra.gmra.mrb[4].mxu1 %v37_v58  ;;  %2180 = vmatprep.subr.bf16.mxu0 %v2179_v60  ;;  %v2199_v58 = vpack.c.bf16 %v272_v53, %v271_v52  ;;  %v256_v60 = vld [vmem:[%s3770_s1 + $0x668] sm:$0xff]  ;;  %v329_v52 = vld [vmem:[%s3770_s1 + $0x8b0] sm:$0xff]  ;;  %v330_v53 = vld [vmem:[%s3770_s1 + $0x8b8] sm:$0xff] }
  0x67   :  { %2210 = vmatpush3.bf16.msra.mxu1 %v2209_v59  ;;  %996 = vmatprep.mubr.f32.mxu1 %v42_v8  ;;  %v255_v59 = vld [vmem:[%s3770_s1 + $0x660] sm:$0xff]  ;;  %v258_v8 = vld [vmem:[%s3770_s1 + $0x678] sm:$0xff]  ;;  %v344_v51 = vld [vmem:[%s3770_s1 + $0x928] sm:$0xff] }
  0x68   :  { %2212 = vmatprep.subr.bf16.mxu1 %v2211_v0  ;;  %v273_v0 = vld [vmem:[%s3770_s1 + $0x6f0] sm:$0xff]  ;;  %v2201_v4 = vpack.c.bf16 %v256_v60, %v255_v59 }
  0x69   :  { %2182 = vmatpush3.bf16.msra.mxu0 %v2181_v7  ;;  %v2203_v6 = vpack.c.bf16 %v274_v1, %v273_v0  ;;  %v257_v7 = vld [vmem:[%s3770_s1 + $0x670] sm:$0xff] }
  0x6a   :  { %2184 = vmatprep.subr.bf16.mxu0 %v2183_v10  ;;  %v2235_v10 = vpack.c.bf16 %v306_v3, %v305_v2  ;;  %v2205_v16 = vpack.c.bf16 %v258_v8, %v257_v7 }
  0x6b   :  { %2214 = vmatpush3.bf16.msra.mxu1 %v2213_v9  ;;  %v289_v9 = vld [vmem:[%s3770_s1 + $0x770] sm:$0xff] }
  0x6c   :  { %2216 = vmatprep.subr.bf16.mxu1 %v2215_v14  ;;  %v355_v14 = vld [vmem:[%s3770_s1 + $0x980] sm:$0xff]  ;;  %v2237_v17 = vpack.c.bf16 %v290_v11, %v289_v9 }
  0x6d   :  { %2186 = vmatpush3.bf16.msra.mxu0 %v2185_v20  ;;  %v308_v20 = vld [vmem:[%s3770_s1 + $0x808] sm:$0xff] }
  0x6e   :  { %2188 = vmatprep.subr.bf16.mxu0 %v2187_v22  ;;  %v2271_v22 = vpack.c.bf16 %v356_v15, %v355_v14  ;;  %v2241_v29 = vpack.c.bf16 %v308_v20, %v307_v19 }
  0x6f   :  { %2218 = vmatpush3.bf16.msra.mxu1 %v2217_v21  ;;  %v339_v21 = vld [vmem:[%s3770_s1 + $0x900] sm:$0xff] }
  0x70   :  { %2220 = vmatprep.subr.bf16.mxu1 %v2219_v26  ;;  %v357_v26 = vld [vmem:[%s3770_s1 + $0x990] sm:$0xff]  ;;  %v2273_v31 = vpack.c.bf16 %v340_v23, %v339_v21 }
  0x71   :  { %2190 = vmatpush3.bf16.msra.mxu0 %v2189_v32  ;;  %v2243_v32 = vpack.c.bf16 %v326_v25, %v325_v24  ;;  %v2275_v36 = vpack.c.bf16 %v358_v27, %v357_v26 }
  0x72   :  { %2192 = vmatprep.subr.bf16.mxu0 %v2191_v34  ;;  %v310_v34 = vld [vmem:[%s3770_s1 + $0x818] sm:$0xff] }
  0x73   :  { %2222 = vmatpush3.bf16.msra.mxu1 %v2221_v33  ;;  %v309_v33 = vld [vmem:[%s3770_s1 + $0x810] sm:$0xff] }
  0x74   :  { %2224 = vmatprep.subr.bf16.mxu1 %v2223_v38  ;;  %v327_v38 = vld [vmem:[%s3770_s1 + $0x8a0] sm:$0xff]  ;;  %v2245_v43 = vpack.c.bf16 %v310_v34, %v309_v33 }
  0x75   :  { %2194 = vmatpush3.bf16.msra.mxu0 %v2193_v44  ;;  %v46_v44 = vld [vmem:[%s3769_s0 + $0x98] sm:$0xff] }
  0x76   :  { %2196 = vmatprep.subr.bf16.mxu0 %v2195_v46  ;;  %v2247_v46 = vpack.c.bf16 %v328_v39, %v327_v38 }
  0x77   :  { %2226 = vmatpush3.bf16.msra.mxu1 %v2225_v45  ;;  %v2277_v45 = vpack.c.bf16 %v342_v37, %v341_v35 }
  0x78   :  { %2228 = vmatprep.subr.bf16.mxu1 %v2227_v50  ;;  %v2279_v50 = vpack.c.bf16 %v360_v41, %v359_v40 }
  0x79   :  { %2198 = vmatpush3.bf16.msra.mxu0 %v2197_v56  ;;  %v2249_v56 = vpack.c.bf16 %v312_v48, %v311_v47 }
  0x7a   :  { %2200 = vmatprep.subr.bf16.mxu0 %v2199_v58 }
  0x7b   :  { %2230 = vmatpush3.bf16.msra.mxu1 %v2229_v57 }
  0x7c   :  { %2232 = vmatprep.subr.bf16.mxu1 %v2231_v62 }
  0x7d   :  { %2202 = vmatpush3.bf16.msra.mxu0 %v2201_v4 }
  0x7e   :  { %2204 = vmatprep.subr.bf16.mxu0 %v2203_v6 }
  0x7f   :  { %2234 = vmatpush3.bf16.msra.mxu1 %v2233_v5 }
  0x80   :  { %2236 = vmatprep.subr.bf16.mxu1 %v2235_v10 }
  0x81   :  { %2206 = vmatpush3.bf16.msra.mxu0 %v2205_v16 }
  0x82   :  { %2240 = vmatprep.subr.bf16.mxu0 %v2239_v18 }
  0x83   :  { %2238 = vmatpush3.bf16.msra.mxu1 %v2237_v17 }
  0x84   :  { %2272 = vmatprep.subr.bf16.mxu1 %v2271_v22  ;;  %927 = vmatmul.mubr.f32.vlgmr.msra.gmra.mrb[6].mxu0 %v39_v28 }
  0x85   :  { %2242 = vmatpush3.bf16.msra.mxu0 %v2241_v29  ;;  %1066 = vmatprep.mubr.f32.mxu0 %v44_v42 }
  0x86   :  { %997 = vmatmul.mubr.f32.vlgmr.msra.gmra.mrb[6].mxu1 %v41_v30  ;;  %2244 = vmatprep.subr.bf16.mxu0 %v2243_v32 }
  0x87   :  { %2274 = vmatpush3.bf16.msra.mxu1 %v2273_v31  ;;  %1136 = vmatprep.mubr.f32.mxu1 %v46_v44 }
  0x88   :  { %2276 = vmatprep.subr.bf16.mxu1 %v2275_v36 }
  0x89   :  { %2246 = vmatpush3.bf16.msra.mxu0 %v2245_v43 }
  0x8a   :  { %12 = vsyncpa [#allocation3], 0  ;;  %2248 = vmatprep.subr.bf16.mxu0 %v2247_v46  ;;  %v2281_v57 = vpack.c.bf16 %v344_v51, %v343_v49  ;;  %v2251_v58 = vpack.c.bf16 %v330_v53, %v329_v52  ;;  %v313_v59 = vld [vmem:[%s3770_s1 + $0x830] sm:$0xff]  ;;  %v314_v60 = vld [vmem:[%s3770_s1 + $0x838] sm:$0xff]  ;;  %v2283_v62 = vpack.c.bf16 %v362_v55, %v361_v54  ;;  %vm2426_vm0 = vmmov 0  }
  0x8b   :  { %2278 = vmatpush3.bf16.msra.mxu1 %v2277_v45  ;;  %v345_v61 = vld [vmem:[%s3770_s1 + $0x930] sm:$0xff]  ;;  %v346_v63 = vld [vmem:[%s3770_s1 + $0x938] sm:$0xff]  ;;  %v331_v0 = vld [vmem:[%s3770_s1 + $0x8c0] sm:$0xff]  ;;  %v2253_v4 = vpack.c.bf16 %v314_v60, %v313_v59  ;;  %vm1306_vm1 = vcmask 1041408   ;;  %vm1302_vm2 = vcmask 408576   ;;  %vm1476_vm3 = vcmask 80896  }
  0x8c   :  { %2280 = vmatprep.subr.bf16.mxu1 %v2279_v50  ;;  %v332_v1 = vld [vmem:[%s3770_s1 + $0x8c8] sm:$0xff]  ;;  %v363_v2 = vld [vmem:[%s3770_s1 + $0x9c0] sm:$0xff]  ;;  %v2285_v5 = vpack.c.bf16 %v346_v63, %v345_v61  ;;  %v333_v12 = vld [vmem:[%s3770_s1 + $0x8d0] sm:$0xff] }
  0x8d   :  { %v364_v3 = vld [vmem:[%s3770_s1 + $0x9c8] sm:$0xff]  ;;  %2250 = vmatpush3.bf16.msra.mxu0 %v2249_v56  ;;  %v2255_v6 = vpack.c.bf16 %v332_v1, %v331_v0  ;;  %v315_v7 = vld [vmem:[%s3770_s1 + $0x840] sm:$0xff]  ;;  %v334_v13 = vld [vmem:[%s3770_s1 + $0x8d8] sm:$0xff] }
  0x8e   :  { %2252 = vmatprep.subr.bf16.mxu0 %v2251_v58  ;;  %v316_v8 = vld [vmem:[%s3770_s1 + $0x848] sm:$0xff]  ;;  %v347_v9 = vld [vmem:[%s3770_s1 + $0x940] sm:$0xff]  ;;  %v2287_v10 = vpack.c.bf16 %v364_v3, %v363_v2  ;;  %v365_v14 = vld [vmem:[%s3770_s1 + $0x9d0] sm:$0xff]  ;;  %v2259_v18 = vpack.c.bf16 %v334_v13, %v333_v12 }
  0x8f   :  { %2282 = vmatpush3.bf16.msra.mxu1 %v2281_v57  ;;  %v348_v11 = vld [vmem:[%s3770_s1 + $0x948] sm:$0xff]  ;;  %v366_v15 = vld [vmem:[%s3770_s1 + $0x9d8] sm:$0xff]  ;;  %v2257_v16 = vpack.c.bf16 %v316_v8, %v315_v7  ;;  %v317_v19 = vld [vmem:[%s3770_s1 + $0x850] sm:$0xff] }
  0x90   :  { %2284 = vmatprep.subr.bf16.mxu1 %v2283_v62  ;;  %v2289_v17 = vpack.c.bf16 %v348_v11, %v347_v9  ;;  %v318_v20 = vld [vmem:[%s3770_s1 + $0x858] sm:$0xff]  ;;  %v349_v21 = vld [vmem:[%s3770_s1 + $0x950] sm:$0xff]  ;;  %v2291_v22 = vpack.c.bf16 %v366_v15, %v365_v14  ;;  %v335_v24 = vld [vmem:[%s3770_s1 + $0x8e0] sm:$0xff] }
  0x91   :  { %2254 = vmatpush3.bf16.msra.mxu0 %v2253_v4  ;;  %v350_v23 = vld [vmem:[%s3770_s1 + $0x958] sm:$0xff]  ;;  %v336_v25 = vld [vmem:[%s3770_s1 + $0x8e8] sm:$0xff]  ;;  %v367_v26 = vld [vmem:[%s3770_s1 + $0x9e0] sm:$0xff]  ;;  %v2261_v28 = vpack.c.bf16 %v318_v20, %v317_v19 }
  0x92   :  { %2256 = vmatprep.subr.bf16.mxu0 %v2255_v6  ;;  %v368_v27 = vld [vmem:[%s3770_s1 + $0x9e8] sm:$0xff]  ;;  %v2293_v29 = vpack.c.bf16 %v350_v23, %v349_v21  ;;  %v2263_v30 = vpack.c.bf16 %v336_v25, %v335_v24  ;;  %v319_v31 = vld [vmem:[%s3770_s1 + $0x860] sm:$0xff]  ;;  %v337_v36 = vld [vmem:[%s3770_s1 + $0x8f0] sm:$0xff] }
  0x93   :  { %2286 = vmatpush3.bf16.msra.mxu1 %v2285_v5  ;;  %v320_v32 = vld [vmem:[%s3770_s1 + $0x868] sm:$0xff]  ;;  %v351_v33 = vld [vmem:[%s3770_s1 + $0x960] sm:$0xff]  ;;  %v2295_v34 = vpack.c.bf16 %v368_v27, %v367_v26  ;;  %v338_v37 = vld [vmem:[%s3770_s1 + $0x8f8] sm:$0xff] }
  0x94   :  { %2288 = vmatprep.subr.bf16.mxu1 %v2287_v10  ;;  %v352_v35 = vld [vmem:[%s3770_s1 + $0x968] sm:$0xff]  ;;  %v369_v38 = vld [vmem:[%s3770_s1 + $0x9f0] sm:$0xff]  ;;  %v370_v39 = vld [vmem:[%s3770_s1 + $0x9f8] sm:$0xff]  ;;  %v2265_v40 = vpack.c.bf16 %v320_v32, %v319_v31  ;;  %v2267_v42 = vpack.c.bf16 %v338_v37, %v337_v36 }
  0x95   :  { %2258 = vmatpush3.bf16.msra.mxu0 %v2257_v16  ;;  %v2297_v41 = vpack.c.bf16 %v352_v35, %v351_v33  ;;  %v321_v43 = vld [vmem:[%s3770_s1 + $0x870] sm:$0xff]  ;;  %v322_v44 = vld [vmem:[%s3770_s1 + $0x878] sm:$0xff]  ;;  %v2299_v46 = vpack.c.bf16 %v370_v39, %v369_v38  ;;  %v387_v48 = vld [vmem:[%s3770_s1 + $0xa80] sm:$0xff] }
  0x96   :  { %2260 = vmatprep.subr.bf16.mxu0 %v2259_v18  ;;  %v353_v45 = vld [vmem:[%s3770_s1 + $0x970] sm:$0xff]  ;;  %v354_v47 = vld [vmem:[%s3770_s1 + $0x978] sm:$0xff]  ;;  %v388_v49 = vld [vmem:[%s3770_s1 + $0xa88] sm:$0xff]  ;;  %v2269_v52 = vpack.c.bf16 %v322_v44, %v321_v43 }
  0x97   :  { %2290 = vmatpush3.bf16.msra.mxu1 %v2289_v17  ;;  %v419_v50 = vld [vmem:[%s3770_s1 + $0xb80] sm:$0xff]  ;;  %v420_v51 = vld [vmem:[%s3770_s1 + $0xb88] sm:$0xff]  ;;  %v2301_v53 = vpack.c.bf16 %v354_v47, %v353_v45  ;;  %v2303_v54 = vpack.c.bf16 %v388_v49, %v387_v48  ;;  %v389_v60 = vld [vmem:[%s3770_s1 + $0xa90] sm:$0xff] }
  0x98   :  { %2292 = vmatprep.subr.bf16.mxu1 %v2291_v22  ;;  %v371_v55 = vld [vmem:[%s3770_s1 + $0xa00] sm:$0xff]  ;;  %v372_v56 = vld [vmem:[%s3770_s1 + $0xa08] sm:$0xff]  ;;  %v2335_v58 = vpack.c.bf16 %v420_v51, %v419_v50  ;;  %v390_v61 = vld [vmem:[%s3770_s1 + $0xa98] sm:$0xff] }
  0x99   :  { %2262 = vmatpush3.bf16.msra.mxu0 %v2261_v28  ;;  %v403_v57 = vld [vmem:[%s3770_s1 + $0xb00] sm:$0xff]  ;;  %v404_v59 = vld [vmem:[%s3770_s1 + $0xb08] sm:$0xff]  ;;  %v421_v62 = vld [vmem:[%s3770_s1 + $0xb90] sm:$0xff]  ;;  %v2305_v1 = vpack.c.bf16 %v372_v56, %v371_v55  ;;  %v2307_v4 = vpack.c.bf16 %v390_v61, %v389_v60 }
  0x9a   :  { %2264 = vmatprep.subr.bf16.mxu0 %v2263_v30  ;;  %v422_v63 = vld [vmem:[%s3770_s1 + $0xb98] sm:$0xff]  ;;  %v43_v0 = vld [vmem:[%s3769_s0 + $0x80] sm:$0xff]  ;;  %v45_v2 = vld [vmem:[%s3769_s0 + $0x90] sm:$0xff]  ;;  %v2337_v3 = vpack.c.bf16 %v404_v59, %v403_v57 }
  0x9b   :  { %2294 = vmatpush3.bf16.msra.mxu1 %v2293_v29  ;;  %v373_v5 = vld [vmem:[%s3770_s1 + $0xa10] sm:$0xff]  ;;  %v374_v6 = vld [vmem:[%s3770_s1 + $0xa18] sm:$0xff]  ;;  %v2339_v8 = vpack.c.bf16 %v422_v63, %v421_v62  ;;  %v391_v10 = vld [vmem:[%s3770_s1 + $0xaa0] sm:$0xff] }
  0x9c   :  { %2296 = vmatprep.subr.bf16.mxu1 %v2295_v34  ;;  %v405_v7 = vld [vmem:[%s3770_s1 + $0xb10] sm:$0xff]  ;;  %v406_v9 = vld [vmem:[%s3770_s1 + $0xb18] sm:$0xff]  ;;  %v392_v11 = vld [vmem:[%s3770_s1 + $0xaa8] sm:$0xff]  ;;  %v2309_v15 = vpack.c.bf16 %v374_v6, %v373_v5 }
  0x9d   :  { %2266 = vmatpush3.bf16.msra.mxu0 %v2265_v40  ;;  %v423_v12 = vld [vmem:[%s3770_s1 + $0xba0] sm:$0xff]  ;;  %v424_v13 = vld [vmem:[%s3770_s1 + $0xba8] sm:$0xff]  ;;  %v50_v16 = vld [vmem:[%s3769_s0 + $0xb8] sm:$0xff]  ;;  %v2341_v17 = vpack.c.bf16 %v406_v9, %v405_v7  ;;  %v2311_v18 = vpack.c.bf16 %v392_v11, %v391_v10 }
  0x9e   :  { %2268 = vmatprep.subr.bf16.mxu0 %v2267_v42  ;;  %v48_v14 = vld [vmem:[%s3769_s0 + $0xa8] sm:$0xff]  ;;  %v375_v19 = vld [vmem:[%s3770_s1 + $0xa20] sm:$0xff]  ;;  %v2343_v22 = vpack.c.bf16 %v424_v13, %v423_v12  ;;  %v393_v24 = vld [vmem:[%s3770_s1 + $0xab0] sm:$0xff] }
  0x9f   :  { %2298 = vmatpush3.bf16.msra.mxu1 %v2297_v41  ;;  %v376_v20 = vld [vmem:[%s3770_s1 + $0xa28] sm:$0xff]  ;;  %v407_v21 = vld [vmem:[%s3770_s1 + $0xb20] sm:$0xff]  ;;  %v394_v25 = vld [vmem:[%s3770_s1 + $0xab8] sm:$0xff] }
  0xa0   :  { %2300 = vmatprep.subr.bf16.mxu1 %v2299_v46  ;;  %v408_v23 = vld [vmem:[%s3770_s1 + $0xb28] sm:$0xff]  ;;  %v425_v26 = vld [vmem:[%s3770_s1 + $0xbb0] sm:$0xff]  ;;  %v426_v27 = vld [vmem:[%s3770_s1 + $0xbb8] sm:$0xff]  ;;  %v2313_v28 = vpack.c.bf16 %v376_v20, %v375_v19  ;;  %v2315_v30 = vpack.c.bf16 %v394_v25, %v393_v24 }
  0xa1   :  { %2270 = vmatpush3.bf16.msra.mxu0 %v2269_v52  ;;  %v2345_v29 = vpack.c.bf16 %v408_v23, %v407_v21  ;;  %v377_v31 = vld [vmem:[%s3770_s1 + $0xa30] sm:$0xff]  ;;  %v378_v32 = vld [vmem:[%s3770_s1 + $0xa38] sm:$0xff]  ;;  %v2347_v34 = vpack.c.bf16 %v426_v27, %v425_v26  ;;  %v395_v36 = vld [vmem:[%s3770_s1 + $0xac0] sm:$0xff] }
  0xa2   :  { %2304 = vmatprep.subr.bf16.mxu0 %v2303_v54  ;;  %v409_v33 = vld [vmem:[%s3770_s1 + $0xb30] sm:$0xff]  ;;  %v410_v35 = vld [vmem:[%s3770_s1 + $0xb38] sm:$0xff]  ;;  %v396_v37 = vld [vmem:[%s3770_s1 + $0xac8] sm:$0xff]  ;;  %v2317_v40 = vpack.c.bf16 %v378_v32, %v377_v31 }
  0xa3   :  { %2302 = vmatpush3.bf16.msra.mxu1 %v2301_v53  ;;  %v427_v38 = vld [vmem:[%s3770_s1 + $0xbc0] sm:$0xff]  ;;  %v428_v39 = vld [vmem:[%s3770_s1 + $0xbc8] sm:$0xff]  ;;  %v2349_v41 = vpack.c.bf16 %v410_v35, %v409_v33  ;;  %v2319_v42 = vpack.c.bf16 %v396_v37, %v395_v36  ;;  %v397_v48 = vld [vmem:[%s3770_s1 + $0xad0] sm:$0xff] }
  0xa4   :  { %2336 = vmatprep.subr.bf16.mxu1 %v2335_v58  ;;  %1067 = vmatmul.mubr.f32.vlgmr.msra.gmra.mrb[8].mxu0 %v43_v0  ;;  %v379_v43 = vld [vmem:[%s3770_s1 + $0xa40] sm:$0xff]  ;;  %v380_v44 = vld [vmem:[%s3770_s1 + $0xa48] sm:$0xff]  ;;  %v2351_v46 = vpack.c.bf16 %v428_v39, %v427_v38  ;;  %v398_v49 = vld [vmem:[%s3770_s1 + $0xad8] sm:$0xff] }
  0xa5   :  { %2306 = vmatpush3.bf16.msra.mxu0 %v2305_v1  ;;  %1206 = vmatprep.mubr.f32.mxu0 %v48_v14  ;;  %v411_v45 = vld [vmem:[%s3770_s1 + $0xb40] sm:$0xff]  ;;  %v412_v47 = vld [vmem:[%s3770_s1 + $0xb48] sm:$0xff]  ;;  %v429_v50 = vld [vmem:[%s3770_s1 + $0xbd0] sm:$0xff]  ;;  %v2321_v52 = vpack.c.bf16 %v380_v44, %v379_v43  ;;  %v2323_v54 = vpack.c.bf16 %v398_v49, %v397_v48  ;;  %v2425_v44 = vmov 0.0|0.0  }
  0xa6   :  { %1137 = vmatmul.mubr.f32.vlgmr.msra.gmra.mrb[8].mxu1 %v45_v2  ;;  %2308 = vmatprep.subr.bf16.mxu0 %v2307_v4  ;;  %v430_v51 = vld [vmem:[%s3770_s1 + $0xbd8] sm:$0xff]  ;;  %v2353_v53 = vpack.c.bf16 %v412_v47, %v411_v45  ;;  %v381_v55 = vld [vmem:[%s3770_s1 + $0xa50] sm:$0xff]  ;;  %v399_v60 = vld [vmem:[%s3770_s1 + $0xae0] sm:$0xff] }
  0xa7   :  { %2338 = vmatpush3.bf16.msra.mxu1 %v2337_v3  ;;  %1276 = vmatprep.mubr.f32.mxu1 %v50_v16  ;;  %v382_v56 = vld [vmem:[%s3770_s1 + $0xa58] sm:$0xff]  ;;  %v413_v57 = vld [vmem:[%s3770_s1 + $0xb50] sm:$0xff]  ;;  %v2355_v58 = vpack.c.bf16 %v430_v51, %v429_v50  ;;  %v400_v61 = vld [vmem:[%s3770_s1 + $0xae8] sm:$0xff]  ;;  %v2427_v51 = vmov 0.0  }
  0xa8   :  { %2340 = vmatprep.subr.bf16.mxu1 %v2339_v8  ;;  %v414_v59 = vld [vmem:[%s3770_s1 + $0xb58] sm:$0xff]  ;;  %v431_v62 = vld [vmem:[%s3770_s1 + $0xbe0] sm:$0xff]  ;;  %v432_v63 = vld [vmem:[%s3770_s1 + $0xbe8] sm:$0xff]  ;;  %v2325_v0 = vpack.c.bf16 %v382_v56, %v381_v55  ;;  %v2327_v2 = vpack.c.bf16 %v400_v61, %v399_v60 }
  0xa9   :  { %2310 = vmatpush3.bf16.msra.mxu0 %v2309_v15  ;;  %v2357_v1 = vpack.c.bf16 %v414_v59, %v413_v57  ;;  %v383_v3 = vld [vmem:[%s3770_s1 + $0xa60] sm:$0xff]  ;;  %v384_v4 = vld [vmem:[%s3770_s1 + $0xa68] sm:$0xff]  ;;  %v2359_v6 = vpack.c.bf16 %v432_v63, %v431_v62  ;;  %v401_v8 = vld [vmem:[%s3770_s1 + $0xaf0] sm:$0xff] }
  0xaa   :  { %2312 = vmatprep.subr.bf16.mxu0 %v2311_v18  ;;  %v415_v5 = vld [vmem:[%s3770_s1 + $0xb60] sm:$0xff]  ;;  %v416_v7 = vld [vmem:[%s3770_s1 + $0xb68] sm:$0xff]  ;;  %v402_v9 = vld [vmem:[%s3770_s1 + $0xaf8] sm:$0xff]  ;;  %v2329_v12 = vpack.c.bf16 %v384_v4, %v383_v3 }
  0xab   :  { %2342 = vmatpush3.bf16.msra.mxu1 %v2341_v17  ;;  %v433_v10 = vld [vmem:[%s3770_s1 + $0xbf0] sm:$0xff]  ;;  %v434_v11 = vld [vmem:[%s3770_s1 + $0xbf8] sm:$0xff]  ;;  %v2361_v13 = vpack.c.bf16 %v416_v7, %v415_v5  ;;  %v2331_v14 = vpack.c.bf16 %v402_v9, %v401_v8  ;;  %v1504_v25 = vld [vmem:[%s3771_s2] ss:$0 sm:$0xff] }
  0xac   :  { %2344 = vmatprep.subr.bf16.mxu1 %v2343_v22  ;;  %v385_v15 = vld [vmem:[%s3770_s1 + $0xa70] sm:$0xff]  ;;  %v386_v16 = vld [vmem:[%s3770_s1 + $0xa78] sm:$0xff]  ;;  %v2363_v17 = vpack.c.bf16 %v434_v11, %v433_v10  ;;  %v47_v22 = vld [vmem:[%s3769_s0 + $0xa0] sm:$0xff] }
  0xad   :  { %2314 = vmatpush3.bf16.msra.mxu0 %v2313_v28  ;;  %v417_v18 = vld [vmem:[%s3770_s1 + $0xb70] sm:$0xff]  ;;  %v418_v19 = vld [vmem:[%s3770_s1 + $0xb78] sm:$0xff]  ;;  %v2333_v20 = vpack.c.bf16 %v386_v16, %v385_v15  ;;  %v1292_v48 = vld [vmem:[%s3772_s3 + $0x20] sm:$0xff] }
  0xae   :  { %2316 = vmatprep.subr.bf16.mxu0 %v2315_v30  ;;  %v2365_v21 = vpack.c.bf16 %v418_v19, %v417_v18  ;;  %v49_v23 = vld [vmem:[%s3769_s0 + $0xb0] sm:$0xff]  ;;  %v1293_v49 = vld [vmem:[%s3772_s3 + $0x28] sm:$0xff] }
  0xaf   :  { %2346 = vmatpush3.bf16.msra.mxu1 %v2345_v29  ;;  %v1290_v45 = vld [vmem:[%s3772_s3 + $0x10] sm:$0xff]  ;;  %v2374_v50 = vpack.c.bf16 %v1293_v49, %v1292_v48 }
  0xb0   :  { %2348 = vmatprep.subr.bf16.mxu1 %v2347_v34 }
  0xb1   :  { %2318 = vmatpush3.bf16.msra.mxu0 %v2317_v40 }
  0xb2   :  { %2320 = vmatprep.subr.bf16.mxu0 %v2319_v42  ;;  %v1289_v42 = vld [vmem:[%s3772_s3 + $0x8] sm:$0xff] }
  0xb3   :  { %2350 = vmatpush3.bf16.msra.mxu1 %v2349_v41  ;;  %v1288_v41 = vld [vmem:[%s3772_s3] sm:$0xff] }
  0xb4   :  { %2352 = vmatprep.subr.bf16.mxu1 %v2351_v46  ;;  %v2368_v43 = vpack.c.bf16 %v1289_v42, %v1288_v41  ;;  %v1291_v46 = vld [vmem:[%s3772_s3 + $0x18] sm:$0xff] }
  0xb5   :  { %2322 = vmatpush3.bf16.msra.mxu0 %v2321_v52  ;;  %v2371_v47 = vpack.c.bf16 %v1291_v46, %v1290_v45  ;;  %v1294_v52 = vld [vmem:[%s3772_s3 + $0x30] sm:$0x3] }
  0xb6   :  { %2324 = vmatprep.subr.bf16.mxu0 %v2323_v54 }
  0xb7   :  { %2354 = vmatpush3.bf16.msra.mxu1 %v2353_v53 }
  0xb8   :  { %2356 = vmatprep.subr.bf16.mxu1 %v2355_v58 }
  0xb9   :  { %2326 = vmatpush3.bf16.msra.mxu0 %v2325_v0 }
  0xba   :  { %2328 = vmatprep.subr.bf16.mxu0 %v2327_v2 }
  0xbb   :  { %2358 = vmatpush3.bf16.msra.mxu1 %v2357_v1 }
  0xbc   :  { %2360 = vmatprep.subr.bf16.mxu1 %v2359_v6 }
  0xbd   :  { %2330 = vmatpush3.bf16.msra.mxu0 %v2329_v12 }
  0xbe   :  { %2332 = vmatprep.subr.bf16.mxu0 %v2331_v14 }
  0xbf   :  { %2362 = vmatpush3.bf16.msra.mxu1 %v2361_v13 }
  0xc0   :  { %2364 = vmatprep.subr.bf16.mxu1 %v2363_v17 }
  0xc1   :  { %2334 = vmatpush3.bf16.msra.mxu0 %v2333_v20 }
  0xc2   :  { %2367 = vmatprep.subr.bf16.mxu0 %v2425_v44 }
  0xc3   :  { %2366 = vmatpush3.bf16.msra.mxu1 %v2365_v21 }
  0xc4   :  { %1207 = vmatmul.mubr.f32.vlgmr.msra.gmra.mrb[10].mxu0 %v47_v22  ;;  %2376 = vmatprep.subr.bf16.mxu1 %v2425_v44 }
  0xc5   :  { %2369 = vmatpush3.bf16.msra.mxu0 %v2368_v43  ;;  %1963 = vmatprep.mubr.msk.f32.mxu0 %vm2426_vm0, %v2427_v51  ;;  %v1510_v43 = vld [vmem:[%s3775_s6] ss:$0 sm:$0xff] }
  0xc6   :  { %1277 = vmatmul.mubr.f32.vlgmr.msra.gmra.mrb[10].mxu1 %v49_v23  ;;  %2370 = vmatprep.subr.bf16.mxu0 %v2425_v44 }
  0xc7   :  { %1980 = vmatprep.mubr.msk.f32.mxu1 %vm2426_vm0, %v2427_v51 }
  0xc9   :  { %2372 = vmatpush3.bf16.msra.mxu0 %v2371_v47 }
  0xca   :  { %2373 = vmatprep.subr.bf16.mxu0 %v2425_v44 }
  0xcd   :  { %2375 = vmatpush3.bf16.msra.mxu0 %v2374_v50 }
  0xce   :  { %1961 = vmatprep.subr.mxu0 %v2427_v51 }
  0xd1   :  { %1962 = vmatpush3.msk.msra.mxu0 %vm1306_vm1, %v1294_v52 }
  0xf7   :  { %v1545_v24 = vpop.f32.mrb[0].mxu0 }
  0xf8   :  { %v1546_v26 = vpop.f32.mrb[1].mxu0 }
  0xf9   :  { %v1580_v27 = vpop.f32.mrb[0].mxu1  ;;  %v1547_v28 = vadd.f32 %v1546_v26, %v1545_v24  ;;  %v1387_v26 = vld [vmem:[%s3774_s5 + $0x8] sm:$0xff] }
  0xfa   :  { %v1581_v29 = vpop.f32.mrb[1].mxu1 }
  0xfb   :  { %v1582_v30 = vadd.f32 %v1581_v29, %v1580_v27  ;;  %v509_v31 = vadd.f32 %v1547_v28, %v1504_v25  ;;  %v1386_v25 = vld [vmem:[%s3774_s5] sm:$0xff]  ;;  %v1388_v28 = vld [vmem:[%s3774_s5 + $0x10] sm:$0xff]  ;;  %v1389_v29 = vld [vmem:[%s3774_s5 + $0x18] sm:$0xff] }
  0xfc   :  { %v2377_v27 = vpack.c.bf16 %v1387_v26, %v1386_v25 }
  0xfd   :  { %v579_v32 = vadd.f32 %v1582_v30, %v509_v31  ;;  %v2380_v30 = vpack.c.bf16 %v1389_v29, %v1388_v28  ;;  %v1390_v31 = vld [vmem:[%s3774_s5 + $0x20] sm:$0xff] }
  0xfe   :  { %2378 = vmatpush3.bf16.msra.mxu1 %v2377_v27 }
  0xff   :  { %2379 = vmatprep.subr.bf16.mxu1 %v2425_v44 }
 0x102   :  { %2381 = vmatpush3.bf16.msra.mxu1 %v2380_v30 }
 0x103   :  { %2382 = vmatprep.subr.bf16.mxu1 %v2425_v44 }
 0x117   :  { %v1615_v33 = vpop.f32.mrb[2].mxu0 }
 0x118   :  { %v1616_v34 = vpop.f32.mrb[3].mxu0 }
 0x119   :  { %v1650_v35 = vpop.f32.mrb[2].mxu1  ;;  %v1617_v36 = vadd.f32 %v1616_v34, %v1615_v33  ;;  %v1392_v34 = vld [vmem:[%s3774_s5 + $0x30] sm:$0x3] }
 0x11a   :  { %v1651_v37 = vpop.f32.mrb[3].mxu1 }
 0x11b   :  { %v1652_v38 = vadd.f32 %v1651_v37, %v1650_v35  ;;  %v649_v39 = vadd.f32 %v1617_v36, %v579_v32  ;;  %v1391_v32 = vld [vmem:[%s3774_s5 + $0x28] sm:$0xff]  ;;  %v1506_v35 = vld [vmem:[%s3773_s4] ss:$0 sm:$0xff]  ;;  %s2428_s4 = smov [#allocation2]  }
 0x11c   :  { %v2383_v33 = vpack.c.bf16 %v1391_v32, %v1390_v31  ;;  %s1496_s5 = sshll.u32 %s2428_s4, 4  ;;  %s1497_s5 = int_to_ptr.vmem [resolvable:$true] %s1496_s5 }
 0x11d   :  { %v719_v40 = vadd.f32 %v1652_v38, %v649_v39  ;;  %s2401_s6 = scalar_lea.vmem %s1497_s5, 128  ;;  %p2406_p1 = scmp.lt.s32.totalorder %s1497_s5, %s1497_s5 }
 0x11e   :  { %2384 = vmatpush3.bf16.msra.mxu1 %v2383_v33  ;;  %p2402_p0 = scmp.ne.s32.totalorder %s1497_s5, %s2401_s6  ;;  %p2407_p2 = scmp.lt.s32.totalorder %s2401_s6, %s2401_s6 }
 0x11f   :  { %1978 = vmatprep.subr.mxu1 %v2427_v51 }
 0x120   :  { %p2408_p3 = por %p2407_p2, %p2406_p1 }
 0x122   :  { %1979 = vmatpush3.msk.msra.mxu1 %vm1306_vm1, %v1392_v34  ;;  %p2409_p4 = pnand %p2408_p3, %p2402_p0 }
 0x137   :  { %v1685_v53 = vpop.f32.mrb[4].mxu0 }
 0x138   :  { %v1686_v54 = vpop.f32.mrb[5].mxu0 }
 0x139   :  { %v1720_v55 = vpop.f32.mrb[4].mxu1  ;;  %v1687_v56 = vadd.f32 %v1686_v54, %v1685_v53 }
 0x13a   :  { %v1721_v57 = vpop.f32.mrb[5].mxu1 }
 0x13b   :  { %v1722_v58 = vadd.f32 %v1721_v57, %v1720_v55  ;;  %v789_v59 = vadd.f32 %v1687_v56, %v719_v40 }
 0x13d   :  { %v859_v60 = vadd.f32 %v1722_v58, %v789_v59 }
 0x157   :  { %v1755_v61 = vpop.f32.mrb[6].mxu0 }
 0x158   :  { %v1756_v62 = vpop.f32.mrb[7].mxu0 }
 0x159   :  { %v1790_v63 = vpop.f32.mrb[6].mxu1  ;;  %v1757_v0 = vadd.f32 %v1756_v62, %v1755_v61 }
 0x15a   :  { %v1791_v1 = vpop.f32.mrb[7].mxu1 }
 0x15b   :  { %v1792_v2 = vadd.f32 %v1791_v1, %v1790_v63  ;;  %v929_v3 = vadd.f32 %v1757_v0, %v859_v60 }
 0x15d   :  { %v999_v4 = vadd.f32 %v1792_v2, %v929_v3 }
 0x177   :  { %v1825_v5 = vpop.f32.mrb[8].mxu0 }
 0x178   :  { %v1826_v6 = vpop.f32.mrb[9].mxu0 }
 0x179   :  { %v1860_v7 = vpop.f32.mrb[8].mxu1  ;;  %v1827_v8 = vadd.f32 %v1826_v6, %v1825_v5 }
 0x17a   :  { %v1861_v9 = vpop.f32.mrb[9].mxu1 }
 0x17b   :  { %v1862_v10 = vadd.f32 %v1861_v9, %v1860_v7  ;;  %v1069_v11 = vadd.f32 %v1827_v8, %v999_v4 }
 0x17d   :  { %v1139_v12 = vadd.f32 %v1862_v10, %v1069_v11 }
 0x197   :  { %v1895_v13 = vpop.f32.mrb[10].mxu0 }
 0x198   :  { %v1896_v14 = vpop.f32.mrb[11].mxu0 }
 0x199   :  { %v1930_v15 = vpop.f32.mrb[10].mxu1  ;;  %v1897_v16 = vadd.f32 %v1896_v14, %v1895_v13 }
 0x19a   :  { %v1931_v17 = vpop.f32.mrb[11].mxu1 }
 0x19b   :  { %v1932_v18 = vadd.f32 %v1931_v17, %v1930_v15  ;;  %v1209_v19 = vadd.f32 %v1897_v16, %v1139_v12 }
 0x19d   :  { %v1279_v20 = vadd.f32 %v1932_v18, %v1209_v19 }
 0x19f   :  { %v1505_v21 = vmul.f32 -1.442695, %v1279_v20 }
 0x1a1   :  { %2389 = vpow2.f32 %v1505_v21 }
 0x1ab   :  { %v2390_v22 = vpop.eup %2389 }
 0x1ac   :  { %v1285_v23 = vadd.f32 1.0, %v2390_v22 }
 0x1ae   :  { %2391 = vrcp.f32 %v1285_v23 }
 0x1b8   :  { %v2392_v24 = vpop.eup %2391 }
 0x1b9   :  { %1964 = vmatmul.mubr.msk.f32.vlgmr.msra.gmra.mrb[12].mxu0 %vm1302_vm2, %v2392_v24 }
 0x28c   :  { %v1376_v36 = vpop.f32.mrb[12].mxu0 }
 0x28d   :  { %v1377_v37 = vadd.f32 %v1506_v35, %v1376_v36  ;;  %v1965_v38 = vpop.f32.mrb[13].mxu0 }
 0x28f   :  { %v1509_v39 = vmul.f32 -1.442695, %v1377_v37 }
 0x291   :  { %2393 = vpow2.f32 %v1509_v39 }
 0x29b   :  { %v2394_v40 = vpop.eup %2393 }
 0x29c   :  { %v1383_v41 = vadd.f32 1.0, %v2394_v40 }
 0x29e   :  { %2395 = vrcp.f32 %v1383_v41 }
 0x2a8   :  { %v2396_v42 = vpop.eup %2395 }
 0x2a9   :  { %1981 = vmatmul.mubr.msk.f32.vlgmr.msra.gmra.mrb[12].mxu1 %vm1302_vm2, %v2396_v42 }
 0x37c   :  { %v1472_v44 = vpop.f32.mrb[12].mxu1 }
 0x37d   :  { %v1473_v45 = vadd.f32 %v1510_v43, %v1472_v44  ;;  %v1982_v46 = vpop.f32.mrb[13].mxu1 }
 0x37f   :  { %v1477_v47 = vsel %vm1476_vm3, %v1473_v45, -inf }
 0x380   :  { %1478 = vmax.xlane.f32.xlu0 %v1477_v47 }
 0x40d   :  { %v1479_v48 = vpop.xlane.xlu0 %1478 }
 0x40e   :  { %v1480_v49 = vsub.f32 %v1473_v45, %v1479_v48 }
 0x410   :  { %v1481_v50 = vmul.f32 1.442695, %v1480_v49 }
 0x412   :  { %2397 = vpow2.f32 %v1481_v50 }
 0x41c   :  { %v2398_v51 = vpop.eup %2397 }
 0x41d   :  { %v1483_v52 = vsel %vm1476_vm3, %v2398_v51, 0.0 }
 0x41e   :  { %1484 = vadd.xlane.f32.xlu0 %v1483_v52 }
 0x4ab   :  { %v1485_v53 = vpop.xlane.xlu0 %1484 }
 0x4ac   :  { %2399 = vlog2.f32 %v1485_v53 }
 0x4b6   :  { %v2400_v54 = vpop.eup %2399 }
 0x4b7   :  { %v1487_v55 = vmul.f32 0.6931472, %v2400_v54 }
 0x4b9   :  { %v1488_v56 = vsub.f32 %v1480_v49, %v1487_v55 }
 0x4bb   :  { %1489 = vst.msk [vmem:[#allocation2] sm:$0xff] %vm1476_vm3, %v1488_v56 }
 0x4bc   :  { %2412 = shalt.err (!%p2409_p4)
}
 0x4bd   :  { %s2413_s18 = scalar_lea.hbm %s3776_s7, 128 }
 0x4be   :  { %p2414_p5 = scmp.ne.s32.totalorder %s3776_s7, %s2413_s18  ;;  %p2417_p6 = scmp.lt.u32.totalorder %s2413_s18, %s3776_s7 }
 0x4c0   :  { %p2419_p7 = pnand %p2417_p6, %p2414_p5 }
 0x4c2   :  { %2422 = shalt.err (!%p2419_p7)
}
 0x4c3   :  { %1499 = dma.vmem_to_hbm [thread:$0]  %s1497_s5, 128, %s3776_s7, [#allocation3]  }
 0x4c4   :  { %2423 = dma.done.wait [#allocation3], 128  }
 0x4c5   :  { %2424 = vsyncadd [#allocation3], 4294967168 }
 0x4c6   :  { %1503 = vsyncpa [#allocation3], 1 }

</bundles_post_ra>
